<compile_context>
chip_gen: v6e
topology: v6e:2x2x1
jax: 0.10.0
libtpu: 0.0.40
codegen_flags: <defaults>
</compile_context>

<pallas_src>
import functools
import math

import jax
import jax.numpy as jnp
import numpy as np
from jax.experimental import pallas as pl
from jax.experimental.pallas import tpu as pltpu

LN_EPS = 1e-6


# ----------------------------- shared helpers -------------------------------
def _layer_norm(x, gamma, beta):
    # PyTorch nn.LayerNorm: biased variance over the last dim, eps inside sqrt.
    mean = jnp.mean(x, axis=-1, keepdims=True)
    var = jnp.mean((x - mean) ** 2, axis=-1, keepdims=True)
    return (x - mean) * jax.lax.rsqrt(var + LN_EPS) * gamma + beta


def _device_kind():
    try:
        return jax.devices()[0].device_kind.lower()
    except Exception:
        return ""


# -------------------------------- fused kernel ------------------------------
def fused_encoder_kernel(x0_ref, bias_ref,
                         wqkv_ref, wo_ref, ln1_ref,
                         w1_ref, fb1_ref, w2_ref, fb2_ref, ln2_ref,
                         o_ref, *, n_head, d_k, d_v):
    """One grid step = one (batch-tile, layer) pair.

    The activation is carried in the VMEM-resident output block: the output
    BlockSpec returns the same block index for every layer, so o_ref holds
    layer l-1's activation when layer l runs.  NOTE: this relies on the layer
    axis staying the innermost, "arbitrary" grid axis — do not reorder the
    grid or mark the layer axis "parallel".
    """
    layer = pl.program_id(1)
    bt, S, D = o_ref.shape
    hdk = n_head * d_k
    hdv = n_head * d_v

    # Layer-0 seed: prologue (pos-enc + LN0) already applied in the wrapper.
    @pl.when(layer == 0)
    def _():
        o_ref[...] = x0_ref[...]

    x = o_ref[...]                                            # (bt, S, D) resident

    # Additive pad-mask bias (0 keep / -1e9 pad), broadcast ONCE per layer
    # (hoisted out of the head loop; JAX does not CSE broadcast_in_dim).
    # For a fully-padded query row this yields softmax over raw scores instead
    # of a uniform distribution — only diverges when an entire row is padding.
    bias = jnp.broadcast_to(bias_ref[...], (bt, S, S))

    wdt = wqkv_ref.dtype          # matmul operand dtype (f32 here, bf16 in prod)

    # ---- fused Q|K|V projection: one MXU pass with a 3x-wide N dim ----
    xm = x.reshape(bt * S, D)
    qkv = jnp.dot(xm.astype(wdt), wqkv_ref[...],
                  preferred_element_type=jnp.float32)         # (bt*S, 2*hdk+hdv)
    # 1/sqrt(d_k) is folded into W_q at parameter-build time (no per-token mul).
    q = qkv[:, :hdk].reshape(bt, S, hdk)
    k = qkv[:, hdk:2 * hdk].reshape(bt, S, hdk)
    v = qkv[:, 2 * hdk:].reshape(bt, S, hdv)

    # ---- attention ----
    # TODO(synk): heads are fused on the input side (one QKV matmul) and the
    # output side (one W_O matmul below); the score/context einsums remain a
    # static per-head loop using single-leading-batch-dim dot_generals, the
    # batched form Mosaic reliably lowers.  For long S use a KV-tiled
    # online-softmax loop instead of the full (bt,S,S) block.
    ctx_heads = []
    for h in range(n_head):                                   # static unroll
        qh = q[:, :, h * d_k:(h + 1) * d_k]
        kh = k[:, :, h * d_k:(h + 1) * d_k]
        vh = v[:, :, h * d_v:(h + 1) * d_v]
        s = jnp.einsum("bqd,bkd->bqk", qh, kh,
                       preferred_element_type=jnp.float32) + bias    # (bt,S,S)
        s = s - jnp.max(s, axis=-1, keepdims=True)
        p = jnp.exp(s)
        inv = pl.reciprocal(jnp.sum(p, axis=-1, keepdims=True), approx=False)
        ctx_heads.append(
            jnp.einsum("bqk,bkd->bqd", p, vh,
                       preferred_element_type=jnp.float32) * inv)     # (bt,S,dv)

    # Single output projection over the full H*d_v contraction dim (full MXU
    # systolic depth) instead of H small-K matmuls accumulated on the VPU.
    ctx = jnp.concatenate(ctx_heads, axis=-1).reshape(bt * S, hdv)
    attn = jnp.dot(ctx.astype(wo_ref.dtype), wo_ref[...],
                   preferred_element_type=jnp.float32)

    x = _layer_norm(attn.reshape(bt, S, D) + x,
                    ln1_ref[0:1, :], ln1_ref[1:2, :])         # residual + LN1

    # ---- position-wise feed forward ----
    # TODO(synk): for production d_inner, stream w1/w2 in d_inner slices so
    # double-buffered FFN weights fit v7x's 64 MiB VMEM.
    xm = x.reshape(bt * S, D)
    h1 = jnp.maximum(
        jnp.dot(xm.astype(w1_ref.dtype), w1_ref[...],
                preferred_element_type=jnp.float32) + fb1_ref[...], 0.0)
    h2 = jnp.dot(h1.astype(w2_ref.dtype), w2_ref[...],
                 preferred_element_type=jnp.float32) + fb2_ref[...]
    o_ref[...] = _layer_norm(h2.reshape(bt, S, D) + x,
                             ln2_ref[0:1, :], ln2_ref[1:2, :])   # residual + LN2


# ------------------------------ pallas wrapper -------------------------------
def encoder_pallas(x0, src_mask, lw, *, n_head, d_k, d_v,
                   batch_tile=None, compute_dtype=jnp.float32):
    """x0: (B,S,D) activation after pos-enc + LayerNorm0; src_mask: (B,1,S)."""
    B, S, D = x0.shape
    L = lw["wqkv"].shape[0]
    n_qkv = lw["wqkv"].shape[2]
    d_inner = lw["w1"].shape[2]
    hdv = n_head * d_v

    kind = _device_kind()
    two_tc = ("v7" in kind) or ("7x" in kind)      # v7x: 2 TensorCores / chip
    if batch_tile is None:
        # v7x: keep a 2-wide "parallel" batch axis so both TCs stay busy.
        # v5e/v6e (single TC): one batch tile, so the stacked layer weights
        # stream from HBM exactly once per forward (lowest HBM traffic).
        if two_tc and B >= 2 and B % 2 == 0:
            batch_tile = B // 2
        else:
            batch_tile = B
    bt = batch_tile
    assert B % bt == 0
    nb = B // bt
    # Note for production sizes: pick bt so bt*S >= 256 on v6e/v7x (>=128 on
    # v5e) and keep D / 3*H*d_k / d_inner multiples of 128 so matmuls run at
    # full MXU occupancy and output stores are lane-dense (unmasked vst).

    # Per-generation VMEM budget: v5e/v6e have 128 MiB physical (default scoped
    # limit is far lower); v7x has 64 MiB per TC -> leave compiler headroom.
    vmem_limit = (48 if two_tc else 64) * 1024 * 1024

    # Additive pad-mask bias (0 keep / -1e9 pad), built once outside the grid.
    bias = (src_mask.astype(jnp.float32) - 1.0) * 1e9          # (B, 1, S)

    # TODO(synk): compute_dtype=jnp.bfloat16 for production (halves weight DMA
    # + double-buffered VMEM, ~2x MXU throughput); f32 kept for the 1e-4 check.
    cast = lambda a: a.astype(compute_dtype)
    wqkv, wo, w1, w2 = cast(lw["wqkv"]), cast(lw["wo"]), cast(lw["w1"]), cast(lw["w2"])

    in_specs = [
        # batch-tile operands (block index only changes with b)
        pl.BlockSpec((bt, S, D), lambda b, l: (b, 0, 0)),      # prologue activation (layer 0)
        pl.BlockSpec((bt, 1, S), lambda b, l: (b, 0, 0)),      # additive pad bias
        # per-layer weights: streamed along the layer axis (auto double-
        # buffered => layer l+1 weights prefetch while layer l computes)
        pl.BlockSpec((None, D, n_qkv), lambda b, l: (l, 0, 0)),
        pl.BlockSpec((None, hdv, D), lambda b, l: (l, 0, 0)),
        pl.BlockSpec((None, 2, D), lambda b, l: (l, 0, 0)),
        pl.BlockSpec((None, D, d_inner), lambda b, l: (l, 0, 0)),
        pl.BlockSpec((None, 1, d_inner), lambda b, l: (l, 0, 0)),
        pl.BlockSpec((None, d_inner, D), lambda b, l: (l, 0, 0)),
        pl.BlockSpec((None, 1, D), lambda b, l: (l, 0, 0)),
        pl.BlockSpec((None, 2, D), lambda b, l: (l, 0, 0)),
    ]
    # Output block index is constant across the layer axis -> the activation
    # stays VMEM-resident across all L layers of each batch tile.
    out_spec = pl.BlockSpec((bt, S, D), lambda b, l: (b, 0, 0))

    kern = functools.partial(fused_encoder_kernel, n_head=n_head, d_k=d_k, d_v=d_v)
    return pl.pallas_call(
        kern,
        out_shape=jax.ShapeDtypeStruct((B, S, D), jnp.float32),
        grid=(nb, L),            # layer axis MUST stay innermost + "arbitrary"
        in_specs=in_specs,
        out_specs=out_spec,
        compiler_params=pltpu.CompilerParams(
            dimension_semantics=("parallel", "arbitrary"),
            vmem_limit_bytes=vmem_limit),
    )(x0, bias, wqkv, wo, lw["ln1"], w1, lw["b1"], w2, lw["b2"], lw["ln2"])


def encoder_forward(src_seq, src_mask, params, *, n_head, d_k, d_v, scale_emb=False):
    """src_seq: (B, S) int32 token ids; src_mask: (B, 1, S) float (1 keep / 0 pad)."""
    B, S = src_seq.shape
    d_model = params["emb"].shape[1]
    # TODO(synk): embedding gather is a data-dependent row lookup; left to XLA.
    x = params["emb"][src_seq]
    if scale_emb:
        x = x * (d_model ** 0.5)
    # Prologue (+pos table, dropout==identity at eval, LayerNorm0) is trivial
    # mem-bound elementwise work: done here so the kernel does not carry the
    # pos table / LN0 params in VMEM across all layers.
    x = x + params["pos_table"][None, :S]
    x0 = _layer_norm(x, params["ln0"][0], params["ln0"][1])
    return encoder_pallas(x0, src_mask, params["layers"],
                          n_head=n_head, d_k=d_k, d_v=d_v)


# ----------------------------- parameter setup ------------------------------
def sinusoid_table(n_position, d_hid):
    pos = np.arange(n_position)[:, None].astype(np.float64)
    hid = np.arange(d_hid)[None, :]
    angle = pos / np.power(10000.0, 2 * (hid // 2) / d_hid)
    table = np.zeros((n_position, d_hid), dtype=np.float64)
    table[:, 0::2] = np.sin(angle[:, 0::2])
    table[:, 1::2] = np.cos(angle[:, 1::2])
    return jnp.asarray(table, dtype=jnp.float32)


def init_params(key, *, n_src_vocab, d_model, n_layers, n_head, d_k, d_v,
                d_inner, pad_idx, n_position):
    keys = jax.random.split(key, 1 + 8 * n_layers)
    ki = iter(keys)

    def nrm(k, shape, scale=0.02):
        return scale * jax.random.normal(k, shape, dtype=jnp.float32)

    emb = nrm(next(ki), (n_src_vocab, d_model), 1.0)
    emb = emb.at[pad_idx].set(0.0)                    # padding_idx row zeroed

    ones_d = jnp.ones((d_model,), jnp.float32)
    zeros_d = jnp.zeros((d_model,), jnp.float32)

    wqkv, wo, ln1, w1, b1, w2, b2, ln2 = ([] for _ in range(8))
    qscale = 1.0 / math.sqrt(d_k)
    for _ in range(n_layers):
        # NOTE: the attention 1/sqrt(d_k) scale is folded into the stored W_q
        # columns (one-time reparameterization).  Both the kernel and the pure-
        # JAX reference consume these folded weights and therefore do NOT apply
        # the explicit /sqrt(d_k); the overall function equals the PyTorch
        # forward with W_q = stored_wq * sqrt(d_k).
        wq = nrm(next(ki), (d_model, n_head * d_k)) * qscale
        wk = nrm(next(ki), (d_model, n_head * d_k))
        wv = nrm(next(ki), (d_model, n_head * d_v))
        wqkv.append(jnp.concatenate([wq, wk, wv], axis=1))
        wo.append(nrm(next(ki), (n_head * d_v, d_model)))
        ln1.append(jnp.stack([ones_d, zeros_d]))
        w1.append(nrm(next(ki), (d_model, d_inner)))
        b1.append(nrm(next(ki), (1, d_inner)))
        w2.append(nrm(next(ki), (d_inner, d_model)))
        b2.append(nrm(next(ki), (1, d_model)))
        ln2.append(jnp.stack([ones_d, zeros_d]))

    return {
        "emb": emb,
        "pos_table": sinusoid_table(n_position, d_model),
        "ln0": jnp.stack([ones_d, zeros_d]),          # (2, D): gamma row 0, beta row 1
        "layers": {                                   # stacked (L, ...) per-layer weights
            "wqkv": jnp.stack(wqkv), "wo": jnp.stack(wo), "ln1": jnp.stack(ln1),
            "w1": jnp.stack(w1), "b1": jnp.stack(b1),
            "w2": jnp.stack(w2), "b2": jnp.stack(b2), "ln2": jnp.stack(ln2),
        },
    }


# ------------------------------ pure-JAX reference ---------------------------
def reference_forward(src_seq, src_mask, params, *, n_head, d_k, d_v, scale_emb=False):
    def ln(x, g, b):
        m = jnp.mean(x, axis=-1, keepdims=True)
        v = jnp.mean((x - m) ** 2, axis=-1, keepdims=True)
        return (x - m) / jnp.sqrt(v + LN_EPS) * g + b

    B, S = src_seq.shape
    D = params["emb"].shape[1]
    x = params["emb"][src_seq]
    if scale_emb:
        x = x * (D ** 0.5)
    x = x + params["pos_table"][None, :S]
    x = ln(x, params["ln0"][0], params["ln0"][1])
    st = params["layers"]
    hdk = n_head * d_k
    for i in range(st["wqkv"].shape[0]):
        wqkv = st["wqkv"][i]
        wq, wk, wv = wqkv[:, :hdk], wqkv[:, hdk:2 * hdk], wqkv[:, 2 * hdk:]
        q = (x @ wq).reshape(B, S, n_head, d_k).transpose(0, 2, 1, 3)
        k = (x @ wk).reshape(B, S, n_head, d_k).transpose(0, 2, 1, 3)
        v = (x @ wv).reshape(B, S, n_head, d_v).transpose(0, 2, 1, 3)
        # No explicit /sqrt(d_k): the scale is folded into W_q (see init_params).
        s = jnp.einsum("bhqd,bhkd->bhqk", q, k)
        s = jnp.where(src_mask[:, None, :, :] > 0, s, -1e9)
        p = jax.nn.softmax(s, axis=-1)
        ctx = jnp.einsum("bhqk,bhkd->bhqd", p, v).transpose(0, 2, 1, 3).reshape(B, S, -1)
        x = ln(ctx @ st["wo"][i] + x, st["ln1"][i, 0], st["ln1"][i, 1])
        h = jnp.maximum(x @ st["w1"][i] + st["b1"][i], 0.0) @ st["w2"][i] + st["b2"][i]
        x = ln(h + x, st["ln2"][i, 0], st["ln2"][i, 1])
    return x


# ----------------------------------- main ------------------------------------
if __name__ == "__main__":
    # small config consistent with Encoder(__init__) shapes
    n_src_vocab, d_model, n_layers = 50, 32, 2
    n_head, d_k, d_v, d_inner = 4, 8, 8, 64
    pad_idx, n_position = 0, 200
    B, S = 2, 8

    key = jax.random.PRNGKey(0)
    kp, ks = jax.random.split(key)
    params = init_params(kp, n_src_vocab=n_src_vocab, d_model=d_model,
                         n_layers=n_layers, n_head=n_head, d_k=d_k, d_v=d_v,
                         d_inner=d_inner, pad_idx=pad_idx, n_position=n_position)

    src_seq = jax.random.randint(ks, (B, S), 1, n_src_vocab, dtype=jnp.int32)
    src_seq = src_seq.at[0, -2:].set(pad_idx)         # exercise the pad mask
    src_mask = (src_seq != pad_idx).astype(jnp.float32)[:, None, :]   # (B, 1, S)

    out = encoder_forward(src_seq, src_mask, params,
                          n_head=n_head, d_k=d_k, d_v=d_v, scale_emb=False)
    out = jax.block_until_ready(out)

    ref = reference_forward(src_seq, src_mask, params,
                            n_head=n_head, d_k=d_k, d_v=d_v, scale_emb=False)
    np.testing.assert_allclose(np.asarray(out), np.asarray(ref), rtol=1e-4, atol=1e-4)
    print("KERNEL_OK")
</pallas_src>

<mosaic_0001>
module attributes {stable_mosaic.version = 11 : i64} {
  func.func @fused_encoder_kernel(%arg0: i32, %arg1: i32, %arg2: memref<2x8x32xf32, #tpu.memory_space<vmem>>, %arg3: memref<2x1x8xf32, #tpu.memory_space<vmem>>, %arg4: memref<1x32x96xf32, #tpu.memory_space<vmem>>, %arg5: memref<1x32x32xf32, #tpu.memory_space<vmem>>, %arg6: memref<1x2x32xf32, #tpu.memory_space<vmem>>, %arg7: memref<1x32x64xf32, #tpu.memory_space<vmem>>, %arg8: memref<1x1x64xf32, #tpu.memory_space<vmem>>, %arg9: memref<1x64x32xf32, #tpu.memory_space<vmem>>, %arg10: memref<1x1x32xf32, #tpu.memory_space<vmem>>, %arg11: memref<1x2x32xf32, #tpu.memory_space<vmem>>, %arg12: memref<2x8x32xf32, #tpu.memory_space<vmem>>) attributes {dimension_semantics = [#tpu.dimension_semantics<parallel>, #tpu.dimension_semantics<arbitrary>], iteration_bounds = array<i64: 1, 2>, scalar_prefetch = 0 : i64, scratch_operands = 0 : i64, tpu.core_type = #tpu.core_type<tc>, window_params = [{transform_indices = @transform_0, window_bounds = array<i64: 2, 8, 32>}, {transform_indices = @transform_1, window_bounds = array<i64: 2, 1, 8>}, {transform_indices = @transform_2, window_bounds = array<i64: 1, 32, 96>}, {transform_indices = @transform_3, window_bounds = array<i64: 1, 32, 32>}, {transform_indices = @transform_4, window_bounds = array<i64: 1, 2, 32>}, {transform_indices = @transform_5, window_bounds = array<i64: 1, 32, 64>}, {transform_indices = @transform_6, window_bounds = array<i64: 1, 1, 64>}, {transform_indices = @transform_7, window_bounds = array<i64: 1, 64, 32>}, {transform_indices = @transform_8, window_bounds = array<i64: 1, 1, 32>}, {transform_indices = @transform_9, window_bounds = array<i64: 1, 2, 32>}, {transform_indices = @transform_10, window_bounds = array<i64: 2, 8, 32>}]} {
    %c0_i32 = arith.constant 0 : i32
    %0 = arith.cmpi eq, %arg1, %c0_i32 : i32
    %1 = arith.extui %0 : i1 to i32
    %c0_i32_0 = arith.constant 0 : i32
    %2 = arith.cmpi ne, %1, %c0_i32_0 : i32
    scf.if %2 {
      %c0_68 = arith.constant 0 : index
      %c0_69 = arith.constant 0 : index
      %c0_70 = arith.constant 0 : index
      %164 = vector.load %arg2[%c0_68, %c0_69, %c0_70] : memref<2x8x32xf32, #tpu.memory_space<vmem>>, vector<2x8x32xf32>
      %c0_71 = arith.constant 0 : index
      %c0_72 = arith.constant 0 : index
      %c0_73 = arith.constant 0 : index
      %165 = vector.load %arg12[%c0_71, %c0_72, %c0_73] : memref<2x8x32xf32, #tpu.memory_space<vmem>>, vector<2x8x32xf32>
      tpu.vector_store %arg12[%c0_71, %c0_72, %c0_73], %164 {strides = array<i32>} : memref<2x8x32xf32, #tpu.memory_space<vmem>>, vector<2x8x32xf32>,
    } else {
    }
    %c0 = arith.constant 0 : index
    %c0_1 = arith.constant 0 : index
    %c0_2 = arith.constant 0 : index
    %3 = vector.load %arg12[%c0, %c0_1, %c0_2] : memref<2x8x32xf32, #tpu.memory_space<vmem>>, vector<2x8x32xf32>
    %c0_3 = arith.constant 0 : index
    %c0_4 = arith.constant 0 : index
    %c0_5 = arith.constant 0 : index
    %4 = vector.load %arg3[%c0_3, %c0_4, %c0_5] : memref<2x1x8xf32, #tpu.memory_space<vmem>>, vector<2x1x8xf32>
    %5 = vector.shape_cast %4 : vector<2x1x8xf32> to vector<2x1x8xf32>
    %6 = vector.broadcast %5 : vector<2x1x8xf32> to vector<2x8x8xf32>
    %7 = vector.shape_cast %3 : vector<2x8x32xf32> to vector<16x32xf32>
    %c0_6 = arith.constant 0 : index
    %c0_7 = arith.constant 0 : index
    %c0_8 = arith.constant 0 : index
    %8 = vector.load %arg4[%c0_6, %c0_7, %c0_8] : memref<1x32x96xf32, #tpu.memory_space<vmem>>, vector<1x32x96xf32>
    %9 = vector.shape_cast %8 : vector<1x32x96xf32> to vector<32x96xf32>
    %cst = arith.constant dense<0.000000e+00> : vector<16x96xf32>
    %10 = tpu.matmul %7, %9, %cst {dimension_numbers = #tpu.dot_dimension_numbers<[1], [0], [0], [1], [0, 0, 1, 1], [], []>} : vector<16x32xf32>, vector<32x96xf32>, vector<16x96xf32> -> vector<16x96xf32>
    %11 = vector.extract_strided_slice %10 {offsets = [0, 0], sizes = [16, 32], strides = [1, 1]} : vector<16x96xf32> to vector<16x32xf32>
    %12 = vector.shape_cast %11 : vector<16x32xf32> to vector<2x8x32xf32>
    %13 = vector.extract_strided_slice %10 {offsets = [0, 32], sizes = [16, 32], strides = [1, 1]} : vector<16x96xf32> to vector<16x32xf32>
    %14 = vector.shape_cast %13 : vector<16x32xf32> to vector<2x8x32xf32>
    %15 = vector.extract_strided_slice %10 {offsets = [0, 64], sizes = [16, 32], strides = [1, 1]} : vector<16x96xf32> to vector<16x32xf32>
    %16 = vector.shape_cast %15 : vector<16x32xf32> to vector<2x8x32xf32>
    %17 = vector.extract_strided_slice %12 {offsets = [0, 0, 0], sizes = [2, 8, 8], strides = [1, 1, 1]} : vector<2x8x32xf32> to vector<2x8x8xf32>
    %18 = vector.extract_strided_slice %14 {offsets = [0, 0, 0], sizes = [2, 8, 8], strides = [1, 1, 1]} : vector<2x8x32xf32> to vector<2x8x8xf32>
    %19 = vector.extract_strided_slice %16 {offsets = [0, 0, 0], sizes = [2, 8, 8], strides = [1, 1, 1]} : vector<2x8x32xf32> to vector<2x8x8xf32>
    "tpu.trace_start"() <{level = 10 : i32, message = "bqd,bkd->bqk"}> : () -> ()
    %cst_9 = arith.constant dense<0.000000e+00> : vector<2x8x8xf32>
    %20 = tpu.matmul %17, %18, %cst_9 {dimension_numbers = #tpu.dot_dimension_numbers<[2], [2], [1], [1], [0, 0, 0, 1, 1, 1], [0], [0]>} : vector<2x8x8xf32>, vector<2x8x8xf32>, vector<2x8x8xf32> -> vector<2x8x8xf32>
    "tpu.trace_stop"() : () -> ()
    %21 = arith.addf %20, %6 : vector<2x8x8xf32>
    %cst_10 = arith.constant dense<0xFF800000> : vector<2x8xf32>
    %22 = vector.multi_reduction <maximumf>, %21, %cst_10 [2] : vector<2x8x8xf32> to vector<2x8xf32>
    %23 = vector.shape_cast %22 : vector<2x8xf32> to vector<2x8x1xf32>
    %24 = vector.broadcast %23 : vector<2x8x1xf32> to vector<2x8x8xf32>
    %25 = arith.subf %21, %24 : vector<2x8x8xf32>
    %26 = math.exp %25 : vector<2x8x8xf32>
    %cst_11 = arith.constant dense<0.000000e+00> : vector<2x8xf32>
    %27 = vector.multi_reduction <add>, %26, %cst_11 [2] : vector<2x8x8xf32> to vector<2x8xf32>
    %28 = vector.shape_cast %27 : vector<2x8xf32> to vector<2x8x1xf32>
    %29 = tpu.reciprocal %28 : vector<2x8x1xf32> -> vector<2x8x1xf32>
    "tpu.trace_start"() <{level = 10 : i32, message = "bqk,bkd->bqd"}> : () -> ()
    %cst_12 = arith.constant dense<0.000000e+00> : vector<2x8x8xf32>
    %30 = tpu.matmul %26, %19, %cst_12 {dimension_numbers = #tpu.dot_dimension_numbers<[2], [1], [1], [2], [0, 0, 0, 1, 1, 2], [0], [0]>} : vector<2x8x8xf32>, vector<2x8x8xf32>, vector<2x8x8xf32> -> vector<2x8x8xf32>
    "tpu.trace_stop"() : () -> ()
    %31 = vector.broadcast %29 : vector<2x8x1xf32> to vector<2x8x8xf32>
    %32 = arith.mulf %30, %31 : vector<2x8x8xf32>
    %33 = vector.extract_strided_slice %12 {offsets = [0, 0, 8], sizes = [2, 8, 8], strides = [1, 1, 1]} : vector<2x8x32xf32> to vector<2x8x8xf32>
    %34 = vector.extract_strided_slice %14 {offsets = [0, 0, 8], sizes = [2, 8, 8], strides = [1, 1, 1]} : vector<2x8x32xf32> to vector<2x8x8xf32>
    %35 = vector.extract_strided_slice %16 {offsets = [0, 0, 8], sizes = [2, 8, 8], strides = [1, 1, 1]} : vector<2x8x32xf32> to vector<2x8x8xf32>
    "tpu.trace_start"() <{level = 10 : i32, message = "bqd,bkd->bqk"}> : () -> ()
    %cst_13 = arith.constant dense<0.000000e+00> : vector<2x8x8xf32>
    %36 = tpu.matmul %33, %34, %cst_13 {dimension_numbers = #tpu.dot_dimension_numbers<[2], [2], [1], [1], [0, 0, 0, 1, 1, 1], [0], [0]>} : vector<2x8x8xf32>, vector<2x8x8xf32>, vector<2x8x8xf32> -> vector<2x8x8xf32>
    "tpu.trace_stop"() : () -> ()
    %37 = arith.addf %36, %6 : vector<2x8x8xf32>
    %cst_14 = arith.constant dense<0xFF800000> : vector<2x8xf32>
    %38 = vector.multi_reduction <maximumf>, %37, %cst_14 [2] : vector<2x8x8xf32> to vector<2x8xf32>
    %39 = vector.shape_cast %38 : vector<2x8xf32> to vector<2x8x1xf32>
    %40 = vector.broadcast %39 : vector<2x8x1xf32> to vector<2x8x8xf32>
    %41 = arith.subf %37, %40 : vector<2x8x8xf32>
    %42 = math.exp %41 : vector<2x8x8xf32>
    %cst_15 = arith.constant dense<0.000000e+00> : vector<2x8xf32>
    %43 = vector.multi_reduction <add>, %42, %cst_15 [2] : vector<2x8x8xf32> to vector<2x8xf32>
    %44 = vector.shape_cast %43 : vector<2x8xf32> to vector<2x8x1xf32>
    %45 = tpu.reciprocal %44 : vector<2x8x1xf32> -> vector<2x8x1xf32>
    "tpu.trace_start"() <{level = 10 : i32, message = "bqk,bkd->bqd"}> : () -> ()
    %cst_16 = arith.constant dense<0.000000e+00> : vector<2x8x8xf32>
    %46 = tpu.matmul %42, %35, %cst_16 {dimension_numbers = #tpu.dot_dimension_numbers<[2], [1], [1], [2], [0, 0, 0, 1, 1, 2], [0], [0]>} : vector<2x8x8xf32>, vector<2x8x8xf32>, vector<2x8x8xf32> -> vector<2x8x8xf32>
    "tpu.trace_stop"() : () -> ()
    %47 = vector.broadcast %45 : vector<2x8x1xf32> to vector<2x8x8xf32>
    %48 = arith.mulf %46, %47 : vector<2x8x8xf32>
    %49 = vector.extract_strided_slice %12 {offsets = [0, 0, 16], sizes = [2, 8, 8], strides = [1, 1, 1]} : vector<2x8x32xf32> to vector<2x8x8xf32>
    %50 = vector.extract_strided_slice %14 {offsets = [0, 0, 16], sizes = [2, 8, 8], strides = [1, 1, 1]} : vector<2x8x32xf32> to vector<2x8x8xf32>
    %51 = vector.extract_strided_slice %16 {offsets = [0, 0, 16], sizes = [2, 8, 8], strides = [1, 1, 1]} : vector<2x8x32xf32> to vector<2x8x8xf32>
    "tpu.trace_start"() <{level = 10 : i32, message = "bqd,bkd->bqk"}> : () -> ()
    %cst_17 = arith.constant dense<0.000000e+00> : vector<2x8x8xf32>
    %52 = tpu.matmul %49, %50, %cst_17 {dimension_numbers = #tpu.dot_dimension_numbers<[2], [2], [1], [1], [0, 0, 0, 1, 1, 1], [0], [0]>} : vector<2x8x8xf32>, vector<2x8x8xf32>, vector<2x8x8xf32> -> vector<2x8x8xf32>
    "tpu.trace_stop"() : () -> ()
    %53 = arith.addf %52, %6 : vector<2x8x8xf32>
    %cst_18 = arith.constant dense<0xFF800000> : vector<2x8xf32>
    %54 = vector.multi_reduction <maximumf>, %53, %cst_18 [2] : vector<2x8x8xf32> to vector<2x8xf32>
    %55 = vector.shape_cast %54 : vector<2x8xf32> to vector<2x8x1xf32>
    %56 = vector.broadcast %55 : vector<2x8x1xf32> to vector<2x8x8xf32>
    %57 = arith.subf %53, %56 : vector<2x8x8xf32>
    %58 = math.exp %57 : vector<2x8x8xf32>
    %cst_19 = arith.constant dense<0.000000e+00> : vector<2x8xf32>
    %59 = vector.multi_reduction <add>, %58, %cst_19 [2] : vector<2x8x8xf32> to vector<2x8xf32>
    %60 = vector.shape_cast %59 : vector<2x8xf32> to vector<2x8x1xf32>
    %61 = tpu.reciprocal %60 : vector<2x8x1xf32> -> vector<2x8x1xf32>
    "tpu.trace_start"() <{level = 10 : i32, message = "bqk,bkd->bqd"}> : () -> ()
    %cst_20 = arith.constant dense<0.000000e+00> : vector<2x8x8xf32>
    %62 = tpu.matmul %58, %51, %cst_20 {dimension_numbers = #tpu.dot_dimension_numbers<[2], [1], [1], [2], [0, 0, 0, 1, 1, 2], [0], [0]>} : vector<2x8x8xf32>, vector<2x8x8xf32>, vector<2x8x8xf32> -> vector<2x8x8xf32>
    "tpu.trace_stop"() : () -> ()
    %63 = vector.broadcast %61 : vector<2x8x1xf32> to vector<2x8x8xf32>
    %64 = arith.mulf %62, %63 : vector<2x8x8xf32>
    %65 = vector.extract_strided_slice %12 {offsets = [0, 0, 24], sizes = [2, 8, 8], strides = [1, 1, 1]} : vector<2x8x32xf32> to vector<2x8x8xf32>
    %66 = vector.extract_strided_slice %14 {offsets = [0, 0, 24], sizes = [2, 8, 8], strides = [1, 1, 1]} : vector<2x8x32xf32> to vector<2x8x8xf32>
    %67 = vector.extract_strided_slice %16 {offsets = [0, 0, 24], sizes = [2, 8, 8], strides = [1, 1, 1]} : vector<2x8x32xf32> to vector<2x8x8xf32>
    "tpu.trace_start"() <{level = 10 : i32, message = "bqd,bkd->bqk"}> : () -> ()
    %cst_21 = arith.constant dense<0.000000e+00> : vector<2x8x8xf32>
    %68 = tpu.matmul %65, %66, %cst_21 {dimension_numbers = #tpu.dot_dimension_numbers<[2], [2], [1], [1], [0, 0, 0, 1, 1, 1], [0], [0]>} : vector<2x8x8xf32>, vector<2x8x8xf32>, vector<2x8x8xf32> -> vector<2x8x8xf32>
    "tpu.trace_stop"() : () -> ()
    %69 = arith.addf %68, %6 : vector<2x8x8xf32>
    %cst_22 = arith.constant dense<0xFF800000> : vector<2x8xf32>
    %70 = vector.multi_reduction <maximumf>, %69, %cst_22 [2] : vector<2x8x8xf32> to vector<2x8xf32>
    %71 = vector.shape_cast %70 : vector<2x8xf32> to vector<2x8x1xf32>
    %72 = vector.broadcast %71 : vector<2x8x1xf32> to vector<2x8x8xf32>
    %73 = arith.subf %69, %72 : vector<2x8x8xf32>
    %74 = math.exp %73 : vector<2x8x8xf32>
    %cst_23 = arith.constant dense<0.000000e+00> : vector<2x8xf32>
    %75 = vector.multi_reduction <add>, %74, %cst_23 [2] : vector<2x8x8xf32> to vector<2x8xf32>
    %76 = vector.shape_cast %75 : vector<2x8xf32> to vector<2x8x1xf32>
    %77 = tpu.reciprocal %76 : vector<2x8x1xf32> -> vector<2x8x1xf32>
    "tpu.trace_start"() <{level = 10 : i32, message = "bqk,bkd->bqd"}> : () -> ()
    %cst_24 = arith.constant dense<0.000000e+00> : vector<2x8x8xf32>
    %78 = tpu.matmul %74, %67, %cst_24 {dimension_numbers = #tpu.dot_dimension_numbers<[2], [1], [1], [2], [0, 0, 0, 1, 1, 2], [0], [0]>} : vector<2x8x8xf32>, vector<2x8x8xf32>, vector<2x8x8xf32> -> vector<2x8x8xf32>
    "tpu.trace_stop"() : () -> ()
    %79 = vector.broadcast %77 : vector<2x8x1xf32> to vector<2x8x8xf32>
    %80 = arith.mulf %78, %79 : vector<2x8x8xf32>
    %81 = tpu.concatenate %32, %48, %64, %80 in 2 : vector<2x8x8xf32>, vector<2x8x8xf32>, vector<2x8x8xf32>, vector<2x8x8xf32> -> vector<2x8x32xf32>
    %82 = vector.shape_cast %81 : vector<2x8x32xf32> to vector<16x32xf32>
    %c0_25 = arith.constant 0 : index
    %c0_26 = arith.constant 0 : index
    %c0_27 = arith.constant 0 : index
    %83 = vector.load %arg5[%c0_25, %c0_26, %c0_27] : memref<1x32x32xf32, #tpu.memory_space<vmem>>, vector<1x32x32xf32>
    %84 = vector.shape_cast %83 : vector<1x32x32xf32> to vector<32x32xf32>
    %cst_28 = arith.constant dense<0.000000e+00> : vector<16x32xf32>
    %85 = tpu.matmul %82, %84, %cst_28 {dimension_numbers = #tpu.dot_dimension_numbers<[1], [0], [0], [1], [0, 0, 1, 1], [], []>} : vector<16x32xf32>, vector<32x32xf32>, vector<16x32xf32> -> vector<16x32xf32>
    %86 = vector.shape_cast %85 : vector<16x32xf32> to vector<2x8x32xf32>
    %87 = arith.addf %86, %3 : vector<2x8x32xf32>
    %c0_29 = arith.constant 0 : index
    %c0_30 = arith.constant 0 : index
    %c0_31 = arith.constant 0 : index
    %88 = vector.load %arg6[%c0_29, %c0_30, %c0_31] : memref<1x2x32xf32, #tpu.memory_space<vmem>>, vector<1x1x32xf32>
    %89 = vector.shape_cast %88 : vector<1x1x32xf32> to vector<1x32xf32>
    %c0_32 = arith.constant 0 : index
    %c1 = arith.constant 1 : index
    %c0_33 = arith.constant 0 : index
    %90 = vector.load %arg6[%c0_32, %c1, %c0_33] : memref<1x2x32xf32, #tpu.memory_space<vmem>>, vector<1x1x32xf32>
    %91 = vector.shape_cast %90 : vector<1x1x32xf32> to vector<1x32xf32>
    %cst_34 = arith.constant dense<0.000000e+00> : vector<2x8xf32>
    %92 = vector.multi_reduction <add>, %87, %cst_34 [2] : vector<2x8x32xf32> to vector<2x8xf32>
    %93 = vector.shape_cast %92 : vector<2x8xf32> to vector<2x8x1xf32>
    %cst_35 = arith.constant 3.200000e+01 : f32
    %94 = vector.broadcast %cst_35 : f32 to vector<2x8x1xf32>
    %95 = arith.divf %93, %94 : vector<2x8x1xf32>
    %96 = vector.broadcast %95 : vector<2x8x1xf32> to vector<2x8x32xf32>
    %97 = arith.subf %87, %96 : vector<2x8x32xf32>
    %98 = arith.mulf %97, %97 : vector<2x8x32xf32>
    %cst_36 = arith.constant dense<0.000000e+00> : vector<2x8xf32>
    %99 = vector.multi_reduction <add>, %98, %cst_36 [2] : vector<2x8x32xf32> to vector<2x8xf32>
    %100 = vector.shape_cast %99 : vector<2x8xf32> to vector<2x8x1xf32>
    %cst_37 = arith.constant 3.200000e+01 : f32
    %101 = vector.broadcast %cst_37 : f32 to vector<2x8x1xf32>
    %102 = arith.divf %100, %101 : vector<2x8x1xf32>
    %103 = vector.broadcast %95 : vector<2x8x1xf32> to vector<2x8x32xf32>
    %104 = arith.subf %87, %103 : vector<2x8x32xf32>
    %cst_38 = arith.constant 9.99999997E-7 : f32
    %105 = vector.broadcast %cst_38 : f32 to vector<2x8x1xf32>
    %106 = arith.addf %102, %105 : vector<2x8x1xf32>
    %107 = math.rsqrt %106 : vector<2x8x1xf32>
    %108 = vector.broadcast %107 : vector<2x8x1xf32> to vector<2x8x32xf32>
    %109 = arith.mulf %104, %108 : vector<2x8x32xf32>
    %110 = vector.shape_cast %89 : vector<1x32xf32> to vector<1x1x32xf32>
    %111 = vector.broadcast %110 : vector<1x1x32xf32> to vector<2x8x32xf32>
    %112 = arith.mulf %109, %111 : vector<2x8x32xf32>
    %113 = vector.shape_cast %91 : vector<1x32xf32> to vector<1x1x32xf32>
    %114 = vector.broadcast %113 : vector<1x1x32xf32> to vector<2x8x32xf32>
    %115 = arith.addf %112, %114 : vector<2x8x32xf32>
    %116 = vector.shape_cast %115 : vector<2x8x32xf32> to vector<16x32xf32>
    %c0_39 = arith.constant 0 : index
    %c0_40 = arith.constant 0 : index
    %c0_41 = arith.constant 0 : index
    %117 = vector.load %arg7[%c0_39, %c0_40, %c0_41] : memref<1x32x64xf32, #tpu.memory_space<vmem>>, vector<1x32x64xf32>
    %118 = vector.shape_cast %117 : vector<1x32x64xf32> to vector<32x64xf32>
    %cst_42 = arith.constant dense<0.000000e+00> : vector<16x64xf32>
    %119 = tpu.matmul %116, %118, %cst_42 {dimension_numbers = #tpu.dot_dimension_numbers<[1], [0], [0], [1], [0, 0, 1, 1], [], []>} : vector<16x32xf32>, vector<32x64xf32>, vector<16x64xf32> -> vector<16x64xf32>
    %c0_43 = arith.constant 0 : index
    %c0_44 = arith.constant 0 : index
    %c0_45 = arith.constant 0 : index
    %120 = vector.load %arg8[%c0_43, %c0_44, %c0_45] : memref<1x1x64xf32, #tpu.memory_space<vmem>>, vector<1x1x64xf32>
    %121 = vector.shape_cast %120 : vector<1x1x64xf32> to vector<1x64xf32>
    %122 = vector.broadcast %121 : vector<1x64xf32> to vector<16x64xf32>
    %123 = arith.addf %119, %122 : vector<16x64xf32>
    %cst_46 = arith.constant 0.000000e+00 : f32
    %124 = vector.broadcast %cst_46 : f32 to vector<16x64xf32>
    %125 = arith.maximumf %123, %124 : vector<16x64xf32>
    %c0_47 = arith.constant 0 : index
    %c0_48 = arith.constant 0 : index
    %c0_49 = arith.constant 0 : index
    %126 = vector.load %arg9[%c0_47, %c0_48, %c0_49] : memref<1x64x32xf32, #tpu.memory_space<vmem>>, vector<1x64x32xf32>
    %127 = vector.shape_cast %126 : vector<1x64x32xf32> to vector<64x32xf32>
    %cst_50 = arith.constant dense<0.000000e+00> : vector<16x32xf32>
    %128 = tpu.matmul %125, %127, %cst_50 {dimension_numbers = #tpu.dot_dimension_numbers<[1], [0], [0], [1], [0, 0, 1, 1], [], []>} : vector<16x64xf32>, vector<64x32xf32>, vector<16x32xf32> -> vector<16x32xf32>
    %c0_51 = arith.constant 0 : index
    %c0_52 = arith.constant 0 : index
    %c0_53 = arith.constant 0 : index
    %129 = vector.load %arg10[%c0_51, %c0_52, %c0_53] : memref<1x1x32xf32, #tpu.memory_space<vmem>>, vector<1x1x32xf32>
    %130 = vector.shape_cast %129 : vector<1x1x32xf32> to vector<1x32xf32>
    %131 = vector.broadcast %130 : vector<1x32xf32> to vector<16x32xf32>
    %132 = arith.addf %128, %131 : vector<16x32xf32>
    %133 = vector.shape_cast %132 : vector<16x32xf32> to vector<2x8x32xf32>
    %134 = arith.addf %133, %115 : vector<2x8x32xf32>
    %c0_54 = arith.constant 0 : index
    %c0_55 = arith.constant 0 : index
    %c0_56 = arith.constant 0 : index
    %135 = vector.load %arg11[%c0_54, %c0_55, %c0_56] : memref<1x2x32xf32, #tpu.memory_space<vmem>>, vector<1x1x32xf32>
    %136 = vector.shape_cast %135 : vector<1x1x32xf32> to vector<1x32xf32>
    %c0_57 = arith.constant 0 : index
    %c1_58 = arith.constant 1 : index
    %c0_59 = arith.constant 0 : index
    %137 = vector.load %arg11[%c0_57, %c1_58, %c0_59] : memref<1x2x32xf32, #tpu.memory_space<vmem>>, vector<1x1x32xf32>
    %138 = vector.shape_cast %137 : vector<1x1x32xf32> to vector<1x32xf32>
    %cst_60 = arith.constant dense<0.000000e+00> : vector<2x8xf32>
    %139 = vector.multi_reduction <add>, %134, %cst_60 [2] : vector<2x8x32xf32> to vector<2x8xf32>
    %140 = vector.shape_cast %139 : vector<2x8xf32> to vector<2x8x1xf32>
    %cst_61 = arith.constant 3.200000e+01 : f32
    %141 = vector.broadcast %cst_61 : f32 to vector<2x8x1xf32>
    %142 = arith.divf %140, %141 : vector<2x8x1xf32>
    %143 = vector.broadcast %142 : vector<2x8x1xf32> to vector<2x8x32xf32>
    %144 = arith.subf %134, %143 : vector<2x8x32xf32>
    %145 = arith.mulf %144, %144 : vector<2x8x32xf32>
    %cst_62 = arith.constant dense<0.000000e+00> : vector<2x8xf32>
    %146 = vector.multi_reduction <add>, %145, %cst_62 [2] : vector<2x8x32xf32> to vector<2x8xf32>
    %147 = vector.shape_cast %146 : vector<2x8xf32> to vector<2x8x1xf32>
    %cst_63 = arith.constant 3.200000e+01 : f32
    %148 = vector.broadcast %cst_63 : f32 to vector<2x8x1xf32>
    %149 = arith.divf %147, %148 : vector<2x8x1xf32>
    %150 = vector.broadcast %142 : vector<2x8x1xf32> to vector<2x8x32xf32>
    %151 = arith.subf %134, %150 : vector<2x8x32xf32>
    %cst_64 = arith.constant 9.99999997E-7 : f32
    %152 = vector.broadcast %cst_64 : f32 to vector<2x8x1xf32>
    %153 = arith.addf %149, %152 : vector<2x8x1xf32>
    %154 = math.rsqrt %153 : vector<2x8x1xf32>
    %155 = vector.broadcast %154 : vector<2x8x1xf32> to vector<2x8x32xf32>
    %156 = arith.mulf %151, %155 : vector<2x8x32xf32>
    %157 = vector.shape_cast %136 : vector<1x32xf32> to vector<1x1x32xf32>
    %158 = vector.broadcast %157 : vector<1x1x32xf32> to vector<2x8x32xf32>
    %159 = arith.mulf %156, %158 : vector<2x8x32xf32>
    %160 = vector.shape_cast %138 : vector<1x32xf32> to vector<1x1x32xf32>
    %161 = vector.broadcast %160 : vector<1x1x32xf32> to vector<2x8x32xf32>
    %162 = arith.addf %159, %161 : vector<2x8x32xf32>
    %c0_65 = arith.constant 0 : index
    %c0_66 = arith.constant 0 : index
    %c0_67 = arith.constant 0 : index
    %163 = vector.load %arg12[%c0_65, %c0_66, %c0_67] : memref<2x8x32xf32, #tpu.memory_space<vmem>>, vector<2x8x32xf32>
    tpu.vector_store %arg12[%c0_65, %c0_66, %c0_67], %162 {strides = array<i32>} : memref<2x8x32xf32, #tpu.memory_space<vmem>>, vector<2x8x32xf32>,
    return
  }
  func.func @transform_0(%arg0: i32, %arg1: i32) -> (i32, i32, i32) {
    %c0_i32 = arith.constant 0 : i32
    %c0_i32_0 = arith.constant 0 : i32
    %c0_i32_1 = arith.constant 0 : i32
    return %arg0, %c0_i32, %c0_i32_0 : i32, i32, i32
  }
  func.func @transform_1(%arg0: i32, %arg1: i32) -> (i32, i32, i32) {
    %c0_i32 = arith.constant 0 : i32
    %c0_i32_0 = arith.constant 0 : i32
    %c0_i32_1 = arith.constant 0 : i32
    return %arg0, %c0_i32, %c0_i32_0 : i32, i32, i32
  }
  func.func @transform_2(%arg0: i32, %arg1: i32) -> (i32, i32, i32) {
    %c0_i32 = arith.constant 0 : i32
    %c0_i32_0 = arith.constant 0 : i32
    %c0_i32_1 = arith.constant 0 : i32
    return %arg1, %c0_i32, %c0_i32_0 : i32, i32, i32
  }
  func.func @transform_3(%arg0: i32, %arg1: i32) -> (i32, i32, i32) {
    %c0_i32 = arith.constant 0 : i32
    %c0_i32_0 = arith.constant 0 : i32
    %c0_i32_1 = arith.constant 0 : i32
    return %arg1, %c0_i32, %c0_i32_0 : i32, i32, i32
  }
  func.func @transform_4(%arg0: i32, %arg1: i32) -> (i32, i32, i32) {
    %c0_i32 = arith.constant 0 : i32
    %c0_i32_0 = arith.constant 0 : i32
    %c0_i32_1 = arith.constant 0 : i32
    return %arg1, %c0_i32, %c0_i32_0 : i32, i32, i32
  }
  func.func @transform_5(%arg0: i32, %arg1: i32) -> (i32, i32, i32) {
    %c0_i32 = arith.constant 0 : i32
    %c0_i32_0 = arith.constant 0 : i32
    %c0_i32_1 = arith.constant 0 : i32
    return %arg1, %c0_i32, %c0_i32_0 : i32, i32, i32
  }
  func.func @transform_6(%arg0: i32, %arg1: i32) -> (i32, i32, i32) {
    %c0_i32 = arith.constant 0 : i32
    %c0_i32_0 = arith.constant 0 : i32
    %c0_i32_1 = arith.constant 0 : i32
    return %arg1, %c0_i32, %c0_i32_0 : i32, i32, i32
  }
  func.func @transform_7(%arg0: i32, %arg1: i32) -> (i32, i32, i32) {
    %c0_i32 = arith.constant 0 : i32
    %c0_i32_0 = arith.constant 0 : i32
    %c0_i32_1 = arith.constant 0 : i32
    return %arg1, %c0_i32, %c0_i32_0 : i32, i32, i32
  }
  func.func @transform_8(%arg0: i32, %arg1: i32) -> (i32, i32, i32) {
    %c0_i32 = arith.constant 0 : i32
    %c0_i32_0 = arith.constant 0 : i32
    %c0_i32_1 = arith.constant 0 : i32
    return %arg1, %c0_i32, %c0_i32_0 : i32, i32, i32
  }
  func.func @transform_9(%arg0: i32, %arg1: i32) -> (i32, i32, i32) {
    %c0_i32 = arith.constant 0 : i32
    %c0_i32_0 = arith.constant 0 : i32
    %c0_i32_1 = arith.constant 0 : i32
    return %arg1, %c0_i32, %c0_i32_0 : i32, i32, i32
  }
  func.func @transform_10(%arg0: i32, %arg1: i32) -> (i32, i32, i32) {
    %c0_i32 = arith.constant 0 : i32
    %c0_i32_0 = arith.constant 0 : i32
    %c0_i32_1 = arith.constant 0 : i32
    return %arg0, %c0_i32, %c0_i32_0 : i32, i32, i32
  }
}

</mosaic_0001>

<bundles_post_ra>
// kernel: tpu_custom_call.1
= control target key start
LH: loop header
LB: loop body
LE: loop exit
PB: predicated region body
PF: predicated region fallthrough
CT: control target
= control target key end

     0   :  { %s3449_s0 = inlined_call_operand.hbm [shape: f32[2,8,32], index: 0, kind: input, shape index: {}]   ;;  %s3450_s1 = inlined_call_operand.hbm [shape: f32[2,1,8], index: 1, kind: input, shape index: {}]   ;;  %s3451_s2 = inlined_call_operand.vmem [shape: f32[2,32,96], index: 2, kind: input, shape index: {}]   ;;  %s3452_s3 = inlined_call_operand.vmem [shape: f32[2,32,32], index: 3, kind: input, shape index: {}]   ;;  %s3453_s4 = inlined_call_operand.vmem [shape: f32[2,2,32], index: 4, kind: input, shape index: {}]   ;;  %s3454_s5 = inlined_call_operand.vmem [shape: f32[2,32,64], index: 5, kind: input, shape index: {}]   ;;  %s3455_s6 = inlined_call_operand.vmem [shape: f32[2,1,64], index: 6, kind: input, shape index: {}]   ;;  %s3456_s7 = inlined_call_operand.vmem [shape: f32[2,64,32], index: 7, kind: input, shape index: {}]   ;;  %s3457_s8 = inlined_call_operand.vmem [shape: f32[2,1,32], index: 8, kind: input, shape index: {}]   ;;  %s3458_s9 = inlined_call_operand.vmem [shape: f32[2,2,32], index: 9, kind: input, shape index: {}]   ;;  %s3459_s10 = inlined_call_operand.hbm [shape: f32[2,8,32], index: 10, kind: output, shape index: {}]  }
   0x1   :  { %3461 = sst [smem:[#allocation11_spill]] %s3449_s0 }
   0x2   :  { %3462 = sst [smem:[#allocation12_spill]] %s3450_s1 }
   0x3   :  { %3463 = sst [smem:[#allocation13_spill]] %s3451_s2 }
   0x4   :  { %3464 = sst [smem:[#allocation14_spill]] %s3452_s3 }
   0x5   :  { %3465 = sst [smem:[#allocation15_spill]] %s3453_s4 }
   0x6   :  { %15 = vsyncpa [#allocation3], 0 }
   0x7   :  { %16 = vsyncpa [#allocation6], 0 }
   0x8   :  { %17 = vsyncpa [#allocation4], 0  ;;  %s3088_s13 = smov 0   ;;  %s3090_s14 = smov 0  }
   0x9   :  { %s3092_s15 = smov 0  }
   0xa LB: > { %s3460_s16 = sadd.s32 4294967295, %s3007_s15   ;;  %s32_s17 = sadd.s32 1, %s3003_s14  ;;  %s3007_s15 = sphi %s3092_s15, %s23_s15   ;;  %s3003_s14 = sphi %s3090_s14, %s3477_s14   ;;  %s2999_s13 = sphi %s3088_s13, %s3476_s13  }
   0xb   : > { %p33_p0 = scmp.ge.s32.totalorder %s32_s17, 2  ;;  %p2526_p1 = scmp.ge.s32.totalorder %s3007_s15, 1 }
   0xc   : > { %p326_p2 = scmp.lt.s32.totalorder %s3007_s15, 3  ;;  %p3115_p4 = scmp.eq.s32.totalorder %s3460_s16, 0 }
   0xd   : > { %s3479_s17 = smov (%p33_p0, %s32_s17), 0  ;;  %s3009_s20 = smov [#allocation2]  }
   0xe   : > { %p3109_p3 = pnand %p2526_p1, %p326_p2  ;;  %s341_s21 = sshll.u32 %s3009_s20, 4  ;;  %s342_s21 = int_to_ptr.vmem [resolvable:$true] %s341_s21 }
   0xf   : > { %s3010_s23 = smov [#allocation5]   ;;  %s2908_s25 = scalar_lea.vmem %s342_s21, 256 }
  0x10   : > { %p2796_p5 = pneg %p3109_p3  ;;  %s357_s24 = sshll.u32 %s3010_s23, 4  ;;  %s358_s24 = int_to_ptr.vmem [resolvable:$true] %s357_s24 }
  0x11   : > { %p2909_p8 = scmp.ne.s32.totalorder %s342_s21, %s2908_s25  ;;  %p2916_p11 = scmp.lt.s32.totalorder %s342_s21, %s342_s21 }
  0x12   : > { %p3123_p6 = pnand %p3115_p4, %p2796_p5  ;;  %p2917_p12 = scmp.lt.s32.totalorder %s2908_s25, %s2908_s25 }
  0x14   : > { %p2899_p7 = pneg %p3123_p6  ;;  %p2918_p13 = por %p2917_p12, %p2916_p11 }
  0x16   : > { %p2911_p9 = pnand %p2909_p8, %p2899_p7 }
  0x18   : > { %p2912_p10 = pneg %p2911_p9 }
  0x1a   : > { %p2919_p0 = pnand %p2918_p13, %p2912_p10 }
  0x1c   : > { %2922 = shalt.err (!%p2919_p0)
}
  0x1d   : > { %s3011_s26 = smov 128   ;;  %s3012_s27 = smov 8  }
  0x1e   : > { %s3469_s0 = sld [smem:[#allocation11_spill]]  ;;  %s2934_s30 = scalar_lea.vmem %s358_s24, 32 }
  0x1f   : > { %p2935_p1 = scmp.ne.s32.totalorder %s358_s24, %s2934_s30  ;;  %p2942_p8 = scmp.lt.s32.totalorder %s358_s24, %s358_s24 }
  0x20   : > { %p2943_p9 = scmp.lt.s32.totalorder %s2934_s30, %s2934_s30 }
  0x21   : > { %p2937_p2 = pnand %p2935_p1, %p2899_p7 }
  0x22   : > { %p2944_p11 = por %p2943_p9, %p2942_p8 }
  0x23   : > { %p2938_p5 = pneg %p2937_p2 }
  0x24   : > { %2799 = dma.hbm_to_vmem [thread:$0]  (!%p3123_p6), %s3469_s0, 256, %s342_s21, [#allocation3], %s3011_s26, %s3011_s26, %s3012_s27  }
  0x25   : > { %p2945_p10 = pnand %p2944_p11, %p2938_p5 }
  0x27   : > { %2948 = shalt.err (!%p2945_p10)
}
  0x28   : > { %s3013_s11 = smov 16   ;;  %s3014_s12 = smov 1  }
  0x29   : > { %s3470_s1 = sld [smem:[#allocation12_spill]] }
  0x2b   : > { %431 = sbr.rel (%p3109_p3) target bundleno = 3343 (0xd0f), region = 60 }
  0x2f   : > { %2802 = dma.hbm_to_vmem [thread:$0]  (!%p3123_p6), %s3470_s1, 32, %s358_s24, [#allocation6], %s3013_s11, %s3013_s11, %s3014_s12  }
  0x30   : > { %2986 = dma.done.wait (%p3115_p4), [#allocation3], 256  }
  0x31   : > { %2988 = vsyncadd (%p3115_p4), [#allocation3], 4294967040 }
  0x32   : > { %2990 = dma.done.wait (%p3115_p4), [#allocation6], 32  }
  0x33   : > { %2992 = vsyncadd (%p3115_p4), [#allocation6], 4294967264  ;;  %p499_p7 = scmp.lt.s32.totalorder %s2999_s13, 1  ;;  %s3471_s2 = sld [smem:[#allocation13_spill]] }
  0x34   : > { %s3472_s3 = sld [smem:[#allocation14_spill]]  ;;  %p2543_p3 = scmp.ne.s32.totalorder %s2999_s13, 0 }
  0x35   : > { %s3157_s21 = scalar_select %p499_p7, %s2999_s13, 1 }
  0x36   : > { %s3473_s4 = sld [smem:[#allocation15_spill]] }
  0x37   : > { %s2588_s18 = sshll.u32 %s3157_s21, 5  ;;  %s2537_s22 = sshll.u32 %s3157_s21, 1 }
  0x38   : > { %s3177_s23 = scalar_lea.vmem %s3454_s5, %s2588_s18  ;;  %s520_s24 = scalar_lea.vmem %s3455_s6, %s3157_s21 }
  0x39   : > { %s503_s26 = scalar_lea.vmem %s3471_s2, %s2588_s18  ;;  %s2591_s25 = sshll.u32 %s3157_s21, 6 }
  0x3a   : > { %s3167_s19 = scalar_lea.vmem %s3472_s3, %s2588_s18  ;;  %s3187_s27 = scalar_lea.vmem %s3456_s7, %s2591_s25 }
  0x3b   : > { %s528_s29 = scalar_lea.vmem %s3457_s8, %s3157_s21  ;;  %s3196_s12 = scalar_lea.vmem %s3458_s9, %s2537_s22 }
  0x3c   : > { %s3172_s11 = scalar_lea.vmem %s3473_s4, %s2537_s22  ;;  %537 = sbr.rel (%p2543_p3) target bundleno = 67 (0x43), region = 72 }
  0x41   : > { %v538_v0 = vld [vmem:[#allocation2] sm:$0xff]  ;;  %vm540_vm0 = vcmask 261120   ;;  %v539_v1 = vld [vmem:[#allocation2 + $0x8] sm:$0xff] }
  0x42   : > { %541 = vst.msk [vmem:[#allocation7] sm:$0xff] %vm540_vm0, %v538_v0  ;;  %542 = vst.msk [vmem:[#allocation7 + $0x8] sm:$0xff] %vm540_vm0, %v539_v1 }
  0x43 PF: > { %v562_v2 = vld [vmem:[%s503_s26 + $0x18] sm:$0xff]  ;;  %v561_v3 = vld [vmem:[%s503_s26 + $0x10] sm:$0xff]  ;;  %vm563_vm1 = vcmask 261120   ;;  %v560_v5 = vld [vmem:[%s503_s26 + $0x8] sm:$0xff]  ;;  %v3015_v8 = vmov 0.0   ;;  %vm3016_vm2 = vmmov 0  }
  0x44   : > { %2652 = vmatprep.subr.mxu1 %v562_v2  ;;  %v559_v6 = vld [vmem:[%s503_s26] sm:$0xff]  ;;  %2673 = vmatprep.subr.mxu0 %v3015_v8  ;;  %s3017_s0 = smov 96   ;;  %s3018_s1 = smov 64   ;;  %vm648_vm3 = vcmask 64512   ;;  %v3239_v14 = vld [vmem:[#allocation5] ss:$0 sm:$0xff] }
  0x45   : > { %2653 = vmatpush3.msra.mxu1 %v562_v2  ;;  %2675 = vmatprep.mubr.msk.f32.mxu0 %vm3016_vm2, %v3015_v8  ;;  %s3019_s2 = smov 88   ;;  %s3020_s3 = smov 120   ;;  %v3242_v18 = vld [vmem:[#allocation5 + $0x1] ss:$0 sm:$0xff]  ;;  %vm1993_vm4 = vcmask 195584   ;;  %vm1990_vm5 = vcmask 130048  }
  0x46   : > { %2654 = vmatprep.subr.mxu1 %v561_v3  ;;  %s3021_s4 = smov 56   ;;  %s3022_s13 = smov 80   ;;  %vm2233_vm6 = vcmask 523264  }
  0x47   : > { %2655 = vmatpush3.msra.mxu1 %v561_v3  ;;  %s3023_s16 = smov 112   ;;  %s3024_s18 = smov 48  }
  0x48   : > { %2656 = vmatprep.subr.mxu1 %v560_v5  ;;  %s3025_s22 = smov 72   ;;  %s3026_s26 = smov 104  }
  0x49   : > { %v3199_v4 = vld [vmem:[#allocation7] sm:$0xff]  ;;  %2657 = vmatpush3.msra.mxu1 %v560_v5  ;;  %v3203_v7 = vld [vmem:[#allocation7 + $0x8] sm:$0xff]  ;;  %s3027_s20 = smov 40   ;;  %s3028_s25 = smov 8  }
  0x4a   : > { %2660 = vmatprep.mubr.msk.f32.mxu1 %vm563_vm1, %v3199_v4  ;;  %2658 = vmatprep.subr.mxu1 %v559_v6  ;;  %s3029_s28 = smov 16   ;;  %s3030_s30 = smov 24  }
  0x4b   : > { %2659 = vmatpush3.msra.mxu1 %v559_v6  ;;  %s3031_s21 = smov [#allocation7]  }
  0x4c   : > { %2661 = vmatmul.mubr.msk.f32.vlgmr.msra.gmra.mxu1 %vm563_vm1, %v3203_v7  ;;  %2663 = vmatprep.subr.mxu1 %v3015_v8 }
  0x4d   : > { %2665 = vmatprep.mubr.msk.f32.mxu1 %vm3016_vm2, %v3015_v8 }
 0x10c   : > { %v3213_v9 = vpop.f32.mrf.mxu1 }
 0x10e   : > { %v3215_v10 = vpop.f32.mrf.mxu1 }
 0x10f   : > { %646 = vrot.lane.b32.xlu0 %v3215_v10, %s3017_s0 }
 0x113   : > { %724 = vrot.lane.b32.xlu0 %v3213_v9, %s3017_s0 }
 0x117   : > { %820 = vrot.lane.b32.xlu0 %v3215_v10, %s3018_s1 }
 0x11b   : > { %976 = vrot.lane.b32.xlu0 %v3215_v10, %s3019_s2 }
 0x11f   : > { %1054 = vrot.lane.b32.xlu0 %v3213_v9, %s3019_s2 }
 0x123   : > { %974 = vrot.lane.b32.xlu0 %v3215_v10, %s3020_s3 }
 0x127   : > { %1052 = vrot.lane.b32.xlu0 %v3213_v9, %s3020_s3 }
 0x12b   : > { %1150 = vrot.lane.b32.xlu0 %v3215_v10, %s3021_s4 }
 0x181   : > { %v647_v11 = vpop.permute.xlu0 %646 }
 0x182   : > { %2664 = vmatpush3.xpose.msk.msra.mxu1 %vm648_vm3, %v647_v11 }
 0x183   : > { %2668 = vmatprep.subr.mxu1 %v3015_v8 }
 0x185   : > { %2666 = vmatmul.mubr.msk.f32.vlgmr.msra.gmra.mxu1 %vm648_vm3, %v3215_v10  ;;  %v725_v12 = vpop.permute.xlu0 %724 }
 0x186   : > { %2669 = vmatpush3.xpose.msk.msra.mxu1 %vm648_vm3, %v725_v12  ;;  %2670 = vmatprep.mubr.msk.f32.mxu1 %vm3016_vm2, %v3015_v8 }
 0x187   : > { %2678 = vmatprep.subr.mxu1 %v3015_v8 }
 0x189   : > { %2671 = vmatmul.mubr.msk.f32.vlgmr.msra.gmra.mxu1 %vm648_vm3, %v3213_v9  ;;  %v821_v13 = vpop.permute.xlu0 %820 }
 0x18a   : > { %2674 = vmatpush3.msra.mxu0 %v821_v13  ;;  %2680 = vmatprep.mubr.msk.f32.mxu1 %vm3016_vm2, %v3015_v8 }
 0x18b   : > { %2683 = vmatprep.subr.mxu0 %v3015_v8 }
 0x18d   : > { %v977_v24 = vpop.permute.xlu0 %976 }
 0x191   : > { %v1055_v29 = vpop.permute.xlu0 %1054 }
 0x195   : > { %v975_v33 = vpop.permute.xlu0 %974 }
 0x199   : > { %v1053_v34 = vpop.permute.xlu0 %1052 }
 0x19d   : > { %v1151_v37 = vpop.permute.xlu0 %1150 }
 0x245   : > { %v719_v15 = vpop.f32.mrf.mxu1 }
 0x246   : > { %v720_v16 = vadd.f32 %v3239_v14, %v719_v15 }
 0x247   : > { %v2667_v17 = vpop.f32.mrf.mxu1 }
 0x248   : > { %v800_v19 = vsel %vm648_vm3, %v720_v16, -inf }
 0x249   : > { %801 = vmax.xlane.f32.xlu1 %v800_v19  ;;  %v796_v20 = vpop.f32.mrf.mxu1 }
 0x24a   : > { %v797_v21 = vadd.f32 %v3242_v18, %v796_v20 }
 0x24b   : > { %v2672_v22 = vpop.f32.mrf.mxu1 }
 0x24c   : > { %v803_v23 = vsel %vm648_vm3, %v797_v21, -inf }
 0x24d   : > { %804 = vmax.xlane.f32.xlu1 %v803_v23 }
 0x25e   : > { %896 = vrot.lane.b32.xlu1 %v3213_v9, %s3018_s1 }
 0x262   : > { %1226 = vrot.lane.b32.xlu1 %v3213_v9, %s3021_s4 }
 0x266   : > { %1306 = vrot.lane.b32.xlu1 %v3215_v10, %s3022_s13 }
 0x2d2   : > { %v802_v25 = vpop.xlane.xlu1 %801 }
 0x2d3   : > { %v806_v26 = vsub.f32 %v720_v16, %v802_v25 }
 0x2d5   : > { %v808_v27 = vmul.f32 1.442695, %v806_v26 }
 0x2d6   : > { %v805_v28 = vpop.xlane.xlu1 %804 }
 0x2d7   : > { %2857 = vpow2.f32 %v808_v27  ;;  %v807_v30 = vsub.f32 %v797_v21, %v805_v28 }
 0x2d9   : > { %v810_v31 = vmul.f32 1.442695, %v807_v30 }
 0x2da   : > { %v897_v32 = vpop.permute.xlu1 %896 }
 0x2db   : > { %2859 = vpow2.f32 %v810_v31  ;;  %2679 = vmatpush3.msra.mxu1 %v897_v32 }
 0x2dc   : > { %2688 = vmatprep.subr.mxu1 %v3015_v8 }
 0x2de   : > { %v1227_v38 = vpop.permute.xlu1 %1226 }
 0x2e2   : > { %v1307_v51 = vpop.permute.xlu1 %1306 }
 0x2e4   : > { %v3253_v35 = vpop.eup %2857 }
 0x2e5   : > { %2676 = vmatmul.mubr.msk.f32.vlgmr.msra.gmra.mxu0 %vm648_vm3, %v3253_v35 }
 0x2e6   : > { %2684 = vmatpush3.xpose.msk.msra.mxu0 %vm648_vm3, %v977_v24  ;;  %2685 = vmatprep.mubr.msk.f32.mxu0 %vm3016_vm2, %v3015_v8 }
 0x2e7   : > { %2693 = vmatprep.subr.mxu0 %v3015_v8 }
 0x2e8   : > { %v3261_v36 = vpop.eup %2859 }
 0x2e9   : > { %2681 = vmatmul.mubr.msk.f32.vlgmr.msra.gmra.mxu1 %vm648_vm3, %v3261_v36  ;;  %2686 = vmatmul.mubr.msk.f32.vlgmr.msra.gmra.mxu0 %vm648_vm3, %v975_v33 }
 0x2ea   : > { %2689 = vmatpush3.xpose.msk.msra.mxu1 %vm648_vm3, %v1055_v29  ;;  %2694 = vmatpush3.msra.mxu0 %v1151_v37 }
 0x2eb   : > { %2690 = vmatprep.mubr.msk.f32.mxu1 %vm3016_vm2, %v3015_v8  ;;  %2698 = vmatprep.subr.mxu1 %v3015_v8 }
 0x2ec   : > { %2695 = vmatprep.mubr.msk.f32.mxu0 %vm3016_vm2, %v3015_v8  ;;  %2703 = vmatprep.subr.mxu0 %v3015_v8 }
 0x2ed   : > { %2691 = vmatmul.mubr.msk.f32.vlgmr.msra.gmra.mxu1 %vm648_vm3, %v1053_v34 }
 0x2ee   : > { %2699 = vmatpush3.msra.mxu1 %v1227_v38  ;;  %2700 = vmatprep.mubr.msk.f32.mxu1 %vm3016_vm2, %v3015_v8 }
 0x2ef   : > { %2708 = vmatprep.subr.mxu1 %v3015_v8 }
 0x3a5   : > { %v3277_v39 = vpop.f32.mrf.mxu0 }
 0x3a7   : > { %v2677_v40 = vpop.f32.mrf.mxu0 }
 0x3a9   : > { %v3279_v41 = vpop.f32.mrf.mxu1  ;;  %v1048_v42 = vpop.f32.mrf.mxu0 }
 0x3aa   : > { %v1049_v43 = vadd.f32 %v3239_v14, %v1048_v42 }
 0x3ab   : > { %v2682_v44 = vpop.f32.mrf.mxu1  ;;  %v2687_v45 = vpop.f32.mrf.mxu0 }
 0x3ac   : > { %v1130_v46 = vsel %vm648_vm3, %v1049_v43, -inf }
 0x3ad   : > { %1131 = vmax.xlane.f32.xlu1 %v1130_v46  ;;  %v1126_v47 = vpop.f32.mrf.mxu1 }
 0x3ae   : > { %v1127_v48 = vadd.f32 %v3242_v18, %v1126_v47 }
 0x3af   : > { %v2692_v49 = vpop.f32.mrf.mxu1 }
 0x3b0   : > { %v1133_v50 = vsel %vm648_vm3, %v1127_v48, -inf }
 0x3b1   : > { %1134 = vmax.xlane.f32.xlu0 %v1133_v50 }
 0x3be   : > { %1304 = vrot.lane.b32.xlu1 %v3215_v10, %s3023_s16 }
 0x3c2   : > { %1556 = vrot.lane.b32.xlu1 %v3213_v9, %s3024_s18 }
 0x3c6   : > { %1636 = vrot.lane.b32.xlu1 %v3215_v10, %s3025_s22 }
 0x3c7   : > { %1384 = vrot.lane.b32.xlu0 %v3213_v9, %s3022_s13 }
 0x3cb   : > { %1382 = vrot.lane.b32.xlu0 %v3213_v9, %s3023_s16 }
 0x3cf   : > { %1480 = vrot.lane.b32.xlu0 %v3215_v10, %s3024_s18 }
 0x436   : > { %v1132_v52 = vpop.xlane.xlu1 %1131 }
 0x437   : > { %v1136_v53 = vsub.f32 %v1049_v43, %v1132_v52 }
 0x439   : > { %v1138_v54 = vmul.f32 1.442695, %v1136_v53 }
 0x43a   : > { %v1135_v55 = vpop.xlane.xlu0 %1134  ;;  %v1305_v61 = vpop.permute.xlu1 %1304 }
 0x43b   : > { %2861 = vpow2.f32 %v1138_v54  ;;  %v1137_v56 = vsub.f32 %v1127_v48, %v1135_v55 }
 0x43d   : > { %v1140_v57 = vmul.f32 1.442695, %v1137_v56 }
 0x43e   : > { %v1385_v58 = vpop.permute.xlu0 %1384  ;;  %v1557_v0 = vpop.permute.xlu1 %1556 }
 0x43f   : > { %2863 = vpow2.f32 %v1140_v57 }
 0x442   : > { %v1383_v59 = vpop.permute.xlu0 %1382  ;;  %v1637_v20 = vpop.permute.xlu1 %1636 }
 0x446   : > { %v1481_v63 = vpop.permute.xlu0 %1480 }
 0x448   : > { %v3293_v60 = vpop.eup %2861 }
 0x449   : > { %2696 = vmatmul.mubr.msk.f32.vlgmr.msra.gmra.mxu0 %vm648_vm3, %v3293_v60 }
 0x44a   : > { %2704 = vmatpush3.xpose.msk.msra.mxu0 %vm648_vm3, %v1307_v51  ;;  %2705 = vmatprep.mubr.msk.f32.mxu0 %vm3016_vm2, %v3015_v8 }
 0x44b   : > { %2713 = vmatprep.subr.mxu0 %v3015_v8 }
 0x44c   : > { %v3301_v62 = vpop.eup %2863 }
 0x44d   : > { %2701 = vmatmul.mubr.msk.f32.vlgmr.msra.gmra.mxu1 %vm648_vm3, %v3301_v62  ;;  %2706 = vmatmul.mubr.msk.f32.vlgmr.msra.gmra.mxu0 %vm648_vm3, %v1305_v61  ;;  %v1145_v48 = vsel %vm648_vm3, %v3301_v62, 0.0 }
 0x44e   : > { %2709 = vmatpush3.xpose.msk.msra.mxu1 %vm648_vm3, %v1385_v58  ;;  %2714 = vmatpush3.msra.mxu0 %v1481_v63  ;;  %v812_v58 = vsel %vm648_vm3, %v3253_v35, 0.0 }
 0x44f   : > { %2710 = vmatprep.mubr.msk.f32.mxu1 %vm3016_vm2, %v3015_v8  ;;  %2718 = vmatprep.subr.mxu1 %v3015_v8 }
 0x450   : > { %2715 = vmatprep.mubr.msk.f32.mxu0 %vm3016_vm2, %v3015_v8  ;;  %2723 = vmatprep.subr.mxu0 %v3015_v8 }
 0x451   : > { %2711 = vmatmul.mubr.msk.f32.vlgmr.msra.gmra.mxu1 %vm648_vm3, %v1383_v59 }
 0x452   : > { %2719 = vmatpush3.msra.mxu1 %v1557_v0  ;;  %2720 = vmatprep.mubr.msk.f32.mxu1 %vm3016_vm2, %v3015_v8 }
 0x453   : > { %2728 = vmatprep.subr.mxu1 %v3015_v8 }
 0x509   : > { %v3317_v1 = vpop.f32.mrf.mxu0 }
 0x50b   : > { %v2697_v2 = vpop.f32.mrf.mxu0 }
 0x50d   : > { %v3319_v3 = vpop.f32.mrf.mxu1  ;;  %v1378_v5 = vpop.f32.mrf.mxu0 }
 0x50e   : > { %v1379_v6 = vadd.f32 %v3239_v14, %v1378_v5 }
 0x50f   : > { %v2702_v11 = vpop.f32.mrf.mxu1  ;;  %v2707_v12 = vpop.f32.mrf.mxu0 }
 0x510   : > { %v1460_v13 = vsel %vm648_vm3, %v1379_v6, -inf }
 0x511   : > { %1461 = vmax.xlane.f32.xlu1 %v1460_v13  ;;  %v1456_v15 = vpop.f32.mrf.mxu1 }
 0x512   : > { %v1457_v16 = vadd.f32 %v3242_v18, %v1456_v15  ;;  %v1999_v15 = vld [vmem:[%s3167_s19 + $0x18] sm:$0xff] }
 0x513   : > { %v2712_v17 = vpop.f32.mrf.mxu1 }
 0x514   : > { %v1463_v19 = vsel %vm648_vm3, %v1457_v16, -inf }
 0x515   : > { %1464 = vmax.xlane.f32.xlu0 %v1463_v19  ;;  %v1996_v19 = vld [vmem:[%s3167_s19] sm:$0xff] }
 0x522   : > { %1634 = vrot.lane.b32.xlu1 %v3215_v10, %s3026_s26 }
 0x52b   : > { %1714 = vrot.lane.b32.xlu0 %v3213_v9, %s3025_s22 }
 0x52f   : > { %1712 = vrot.lane.b32.xlu0 %v3213_v9, %s3026_s26 }
 0x59a   : > { %v1462_v21 = vpop.xlane.xlu1 %1461 }
 0x59b   : > { %v1466_v22 = vsub.f32 %v1379_v6, %v1462_v21 }
 0x59d   : > { %v1468_v23 = vmul.f32 1.442695, %v1466_v22 }
 0x59e   : > { %v1465_v24 = vpop.xlane.xlu0 %1464  ;;  %v1635_v30 = vpop.permute.xlu1 %1634 }
 0x59f   : > { %2865 = vpow2.f32 %v1468_v23  ;;  %v1467_v25 = vsub.f32 %v1457_v16, %v1465_v24 }
 0x5a1   : > { %v1470_v26 = vmul.f32 1.442695, %v1467_v25 }
 0x5a2   : > { %v1715_v28 = vpop.permute.xlu0 %1714 }
 0x5a3   : > { %2867 = vpow2.f32 %v1470_v26 }
 0x5a6   : > { %v1713_v31 = vpop.permute.xlu0 %1712 }
 0x5ac   : > { %v2866_v27 = vpop.eup %2865 }
 0x5ad   : > { %2716 = vmatmul.mubr.msk.f32.vlgmr.msra.gmra.mxu0 %vm648_vm3, %v2866_v27 }
 0x5ae   : > { %2724 = vmatpush3.xpose.msk.msra.mxu0 %vm648_vm3, %v1637_v20  ;;  %2725 = vmatprep.mubr.msk.f32.mxu0 %vm3016_vm2, %v3015_v8 }
 0x5af   : > { %2733 = vmatprep.subr.mxu0 %v3015_v8 }
 0x5b0   : > { %v2868_v29 = vpop.eup %2867 }
 0x5b1   : > { %2721 = vmatmul.mubr.msk.f32.vlgmr.msra.gmra.mxu1 %vm648_vm3, %v2868_v29  ;;  %2726 = vmatmul.mubr.msk.f32.vlgmr.msra.gmra.mxu0 %vm648_vm3, %v1635_v30 }
 0x5b2   : > { %2729 = vmatpush3.xpose.msk.msra.mxu1 %vm648_vm3, %v1715_v28  ;;  %2730 = vmatprep.mubr.msk.f32.mxu1 %vm3016_vm2, %v3015_v8 }
 0x5b3   : > { %2738 = vmatprep.subr.mxu1 %v3015_v8  ;;  %2735 = vmatprep.mubr.msk.f32.mxu0 %vm3016_vm2, %v3015_v8 }
 0x5b5   : > { %2731 = vmatmul.mubr.msk.f32.vlgmr.msra.gmra.mxu1 %vm648_vm3, %v1713_v31 }
 0x5b6   : > { %2740 = vmatprep.mubr.msk.f32.mxu1 %vm3016_vm2, %v3015_v8  ;;  %v1142_v8 = vsel %vm648_vm3, %v3293_v60, 0.0  ;;  %v815_v60 = vsel %vm648_vm3, %v3261_v36, 0.0 }
 0x66d   : > { %v3345_v32 = vpop.f32.mrf.mxu0 }
 0x66f   : > { %v2717_v33 = vpop.f32.mrf.mxu0 }
 0x671   : > { %v1628_v34 = vpop.f32.mrf.mxu1  ;;  %v1708_v37 = vpop.f32.mrf.mxu0 }
 0x672   : > { %v1709_v38 = vadd.f32 %v3239_v14, %v1708_v37  ;;  %v1475_v14 = vsel %vm648_vm3, %v2868_v29, 0.0 }
 0x673   : > { %v2722_v40 = vpop.f32.mrf.mxu1  ;;  %v2727_v42 = vpop.f32.mrf.mxu0 }
 0x674   : > { %v1790_v43 = vsel %vm648_vm3, %v1709_v38, -inf }
 0x675   : > { %1791 = vmax.xlane.f32.xlu1 %v1790_v43  ;;  %v1786_v44 = vpop.f32.mrf.mxu1 }
 0x676   : > { %v1787_v45 = vadd.f32 %v3242_v18, %v1786_v44  ;;  %v1472_v18 = vsel %vm648_vm3, %v2866_v27, 0.0 }
 0x677   : > { %v2732_v46 = vpop.f32.mrf.mxu1 }
 0x678   : > { %v1793_v47 = vsel %vm648_vm3, %v1787_v45, -inf }
 0x679   : > { %1794 = vmax.xlane.f32.xlu0 %v1793_v47 }
 0x686   : > { %1886 = vrot.lane.b32.xlu1 %v3213_v9, %s3027_s20 }
 0x68f   : > { %1810 = vrot.lane.b32.xlu0 %v3215_v10, %s3027_s20 }
 0x6aa   : > { %1143 = vadd.xlane.f32.xlu1 %v1142_v8 }
 0x6ae   : > { %1476 = vadd.xlane.f32.xlu1 %v1475_v14  ;;  %1146 = vadd.xlane.f32.xlu0 %v1145_v48 }
 0x6b2   : > { %1473 = vadd.xlane.f32.xlu0 %v1472_v18 }
 0x6fe   : > { %v1792_v49 = vpop.xlane.xlu1 %1791 }
 0x6ff   : > { %v1796_v50 = vsub.f32 %v1709_v38, %v1792_v49 }
 0x701   : > { %v1798_v51 = vmul.f32 1.442695, %v1796_v50 }
 0x702   : > { %v1887_v9 = vpop.permute.xlu1 %1886  ;;  %v1795_v52 = vpop.xlane.xlu0 %1794 }
 0x703   : > { %2869 = vpow2.f32 %v1798_v51  ;;  %v1797_v10 = vsub.f32 %v1787_v45, %v1795_v52  ;;  %2739 = vmatpush3.msra.mxu1 %v1887_v9 }
 0x705   : > { %v1800_v53 = vmul.f32 1.442695, %v1797_v10 }
 0x706   : > { %v1811_v54 = vpop.permute.xlu0 %1810 }
 0x707   : > { %2871 = vpow2.f32 %v1800_v53  ;;  %2734 = vmatpush3.msra.mxu0 %v1811_v54 }
 0x708   : > { %2743 = vmatprep.subr.mxu0 %v1999_v15 }
 0x710   : > { %v2870_v55 = vpop.eup %2869 }
 0x711   : > { %2736 = vmatmul.mubr.msk.f32.vlgmr.msra.gmra.mxu0 %vm648_vm3, %v2870_v55  ;;  %v1802_v56 = vsel %vm648_vm3, %v2870_v55, 0.0 }
 0x712   : > { %1803 = vadd.xlane.f32.xlu0 %v1802_v56  ;;  %2744 = vmatpush3.msra.mxu0 %v1999_v15 }
 0x714   : > { %v2872_v57 = vpop.eup %2871 }
 0x715   : > { %2741 = vmatmul.mubr.msk.f32.vlgmr.msra.gmra.mxu1 %vm648_vm3, %v2872_v57  ;;  %v1805_v59 = vsel %vm648_vm3, %v2872_v57, 0.0  ;;  %v2127_v57 = vld [vmem:[%s3177_s23 + $0x18] sm:$0xff] }
 0x716   : > { %813 = vadd.xlane.f32.xlu0 %v812_v58  ;;  %1806 = vadd.xlane.f32.xlu1 %v1805_v59  ;;  %v2126_v58 = vld [vmem:[%s3177_s23 + $0x10] sm:$0xff]  ;;  %v2125_v59 = vld [vmem:[%s3177_s23 + $0x8] sm:$0xff] }
 0x717   : > { %2754 = vmatprep.subr.mxu1 %v2127_v57 }
 0x718   : > { %2755 = vmatpush3.msra.mxu1 %v2127_v57  ;;  %v2583_v57 = vld [vmem:[%s3196_s12 + $0x1] ss:$0 sm:$0xff] }
 0x719   : > { %2756 = vmatprep.subr.mxu1 %v2126_v58 }
 0x71a   : > { %816 = vadd.xlane.f32.xlu1 %v815_v60  ;;  %2757 = vmatpush3.msra.mxu1 %v2126_v58  ;;  %v2124_v60 = vld [vmem:[%s3177_s23] sm:$0xff] }
 0x71b   : > { %2758 = vmatprep.subr.mxu1 %v2125_v59 }
 0x71c   : > { %2759 = vmatpush3.msra.mxu1 %v2125_v59 }
 0x71d   : > { %2760 = vmatprep.subr.mxu1 %v2124_v60 }
 0x71e   : > { %2761 = vmatpush3.msra.mxu1 %v2124_v60 }
 0x733   : > { %v1144_v61 = vpop.xlane.xlu1 %1143 }
 0x734   : > { %2873 = vrcp.f32 %v1144_v61  ;;  %v2225_v61 = vld [vmem:[%s3187_s27 + $0x38] sm:$0xff] }
 0x737   : > { %v1477_v62 = vpop.xlane.xlu1 %1476  ;;  %v1147_v63 = vpop.xlane.xlu0 %1146 }
 0x738   : > { %2875 = vrcp.f32 %v1477_v62  ;;  %v2224_v62 = vld [vmem:[%s3187_s27 + $0x30] sm:$0xff] }
 0x739   : > { %2877 = vrcp.f32 %v1147_v63  ;;  %v2223_v63 = vld [vmem:[%s3187_s27 + $0x28] sm:$0xff] }
 0x73b   : > { %v1474_v0 = vpop.xlane.xlu0 %1473 }
 0x73c   : > { %2879 = vrcp.f32 %v1474_v0  ;;  %v2222_v0 = vld [vmem:[%s3187_s27 + $0x20] sm:$0xff] }
 0x741   : > { %v2874_v2 = vpop.eup %2873 }
 0x742   : > { %v1302_v35 = vmul.f32 %v2874_v2, %v3317_v1  ;;  %v1998_v1 = vld [vmem:[%s3167_s19 + $0x10] sm:$0xff] }
 0x743   : > { %2745 = vmatprep.subr.mxu0 %v1998_v1 }
 0x744   : > { %1966 = vrot.lane.b32.xlu0 %v1302_v35, %s3028_s25  ;;  %2746 = vmatpush3.msra.mxu0 %v1998_v1 }
 0x745   : > { %v2876_v5 = vpop.eup %2875 }
 0x746   : > { %v2878_v6 = vpop.eup %2877  ;;  %v1633_v36 = vmul.f32 %v2876_v5, %v1628_v34 }
 0x747   : > { %v1303_v11 = vmul.f32 %v2878_v6, %v3319_v3  ;;  %v1997_v3 = vld [vmem:[%s3167_s19 + $0x8] sm:$0xff] }
 0x748   : > { %1976 = vrot.lane.b32.xlu0 %v1633_v36, %s3029_s28  ;;  %2747 = vmatprep.subr.mxu0 %v1997_v3 }
 0x749   : > { %v2880_v12 = vpop.eup %2879  ;;  %1968 = vrot.lane.b32.xlu1 %v1303_v11, %s3028_s25  ;;  %2748 = vmatpush3.msra.mxu0 %v1997_v3  ;;  %v2575_v3 = vld [vmem:[%s3172_s11 + $0x1] ss:$0 sm:$0xff] }
 0x74a   : > { %v1632_v13 = vmul.f32 %v2880_v12, %v3345_v32  ;;  %2749 = vmatprep.subr.mxu0 %v1996_v19 }
 0x74b   : > { %2750 = vmatpush3.msra.mxu0 %v1996_v19 }
 0x74c   : > { %2765 = vmatprep.subr.mxu0 %v2225_v61 }
 0x74d   : > { %1974 = vrot.lane.b32.xlu1 %v1632_v13, %s3029_s28  ;;  %v2574_v13 = vld [vmem:[%s3172_s11] ss:$0 sm:$0xff] }
 0x79b   : > { %v1804_v16 = vpop.xlane.xlu0 %1803 }
 0x79c   : > { %2881 = vrcp.f32 %v1804_v16 }
 0x79f   : > { %v1807_v17 = vpop.xlane.xlu1 %1806  ;;  %v814_v28 = vpop.xlane.xlu0 %813 }
 0x7a0   : > { %2883 = vrcp.f32 %v1807_v17 }
 0x7a1   : > { %2885 = vrcp.f32 %v814_v28 }
 0x7a3   : > { %v817_v29 = vpop.xlane.xlu1 %816 }
 0x7a4   : > { %2887 = vrcp.f32 %v817_v29 }
 0x7a9   : > { %v2882_v20 = vpop.eup %2881 }
 0x7ad   : > { %v2884_v24 = vpop.eup %2883 }
 0x7ae   : > { %v2886_v31 = vpop.eup %2885 }
 0x7af   : > { %v972_v37 = vmul.f32 %v2886_v31, %v3277_v39 }
 0x7b1   : > { %v2888_v33 = vpop.eup %2887 }
 0x7b2   : > { %v973_v40 = vmul.f32 %v2888_v33, %v3279_v41  ;;  %v2579_v33 = vld [vmem:[%s528_s29] ss:$0 sm:$0xff] }
 0x7b6   : > { %v1967_v32 = vpop.permute.xlu0 %1966 }
 0x7b7   : > { %v1988_v38 = vsel %vm648_vm3, %v972_v37, %v1967_v32 }
 0x7ba   : > { %v1977_v42 = vpop.permute.xlu0 %1976 }
 0x7bb   : > { %v1969_v30 = vpop.permute.xlu1 %1968 }
 0x7bc   : > { %v1989_v45 = vsel %vm648_vm3, %v973_v40, %v1969_v30 }
 0x7bd   : > { %v1992_v47 = vsel %vm1990_vm5, %v1989_v45, %v1977_v42 }
 0x7bf   : > { %v1975_v34 = vpop.permute.xlu1 %1974 }
 0x7c0   : > { %v1991_v43 = vsel %vm1990_vm5, %v1988_v38, %v1975_v34 }
 0x7d1   : > { %v1882_v21 = vpop.f32.mrf.mxu0 }
 0x7d2   : > { %v1962_v22 = vmul.f32 %v2882_v20, %v1882_v21 }
 0x7d3   : > { %v2737_v23 = vpop.f32.mrf.mxu0 }
 0x7d4   : > { %1982 = vrot.lane.b32.xlu1 %v1962_v22, %s3030_s30  ;;  %v2221_v22 = vld [vmem:[%s3187_s27 + $0x18] sm:$0xff]  ;;  %v2220_v23 = vld [vmem:[%s3187_s27 + $0x10] sm:$0xff] }
 0x7d5   : > { %v1958_v25 = vpop.f32.mrf.mxu1 }
 0x7d6   : > { %v1963_v26 = vmul.f32 %v2884_v24, %v1958_v25  ;;  %v2219_v24 = vld [vmem:[%s3187_s27 + $0x8] sm:$0xff]  ;;  %v2218_v25 = vld [vmem:[%s3187_s27] sm:$0xff]  ;;  %s3474_s27 = sadd.s32 4294967295, %s3007_s15  }
 0x7d7   : > { %v2742_v27 = vpop.f32.mrf.mxu1  ;;  %p3422_p4 = scmp.eq.s32.totalorder %s3474_s27, 1 }
 0x7d8   : > { %1984 = vrot.lane.b32.xlu0 %v1963_v26, %s3030_s30  ;;  %v2576_v26 = vld [vmem:[%s520_s24] ss:$0 sm:$0xff]  ;;  %s2368_s24 = sshll.u32 %s3031_s21, 4  ;;  %s2369_s24 = int_to_ptr.vmem [resolvable:$true] %s2368_s24 }
 0x7d9   : > { %s2949_s1 = scalar_lea.vmem %s2369_s24, 256  ;;  %p2956_p0 = scmp.lt.s32.totalorder %s2369_s24, %s2369_s24 }
 0x7da   : > { %p2950_p6 = scmp.ne.s32.totalorder %s2369_s24, %s2949_s1  ;;  %p2957_p1 = scmp.lt.s32.totalorder %s2949_s1, %s2949_s1 }
 0x7dc   : > { %p2951_p12 = pnand %p2950_p6, %p3422_p4  ;;  %p2958_p2 = por %p2957_p1, %p2956_p0 }
 0x7de   : > { %p2952_p13 = pneg %p2951_p12 }
 0x7e0   : > { %p2959_p5 = pnand %p2958_p2, %p2952_p13 }
 0x846   : > { %v1983_v44 = vpop.permute.xlu1 %1982 }
 0x847   : > { %v1994_v46 = vsel %vm1993_vm4, %v1991_v43, %v1983_v44 }
 0x848   : > { %2751 = vmatprep.mubr.msk.f32.mxu0 %vm563_vm1, %v1994_v46 }
 0x84a   : > { %v1985_v8 = vpop.permute.xlu0 %1984 }
 0x84b   : > { %v1995_v14 = vsel %vm1993_vm4, %v1992_v47, %v1985_v8 }
 0x84c   : > { %2752 = vmatmul.mubr.msk.f32.vlgmr.msra.gmra.mxu0 %vm563_vm1, %v1995_v14 }
 0x84d   : > { %2766 = vmatpush3.msra.mxu0 %v2225_v61 }
 0x84e   : > { %2767 = vmatprep.subr.mxu0 %v2224_v62 }
 0x84f   : > { %2768 = vmatpush3.msra.mxu0 %v2224_v62 }
 0x850   : > { %2769 = vmatprep.subr.mxu0 %v2223_v63 }
 0x851   : > { %2770 = vmatpush3.msra.mxu0 %v2223_v63 }
 0x852   : > { %2771 = vmatprep.subr.mxu0 %v2222_v0 }
 0x853   : > { %2772 = vmatpush3.msra.mxu0 %v2222_v0 }
 0x854   : > { %2773 = vmatprep.subr.mxu0 %v2221_v22 }
 0x855   : > { %2774 = vmatpush3.msra.mxu0 %v2221_v22 }
 0x856   : > { %2775 = vmatprep.subr.mxu0 %v2220_v23 }
 0x857   : > { %2776 = vmatpush3.msra.mxu0 %v2220_v23 }
 0x858   : > { %2777 = vmatprep.subr.mxu0 %v2219_v24 }
 0x859   : > { %2778 = vmatpush3.msra.mxu0 %v2219_v24 }
 0x85a   : > { %2779 = vmatprep.subr.mxu0 %v2218_v25 }
 0x85b   : > { %2780 = vmatpush3.msra.mxu0 %v2218_v25 }
 0x90c   : > { %v2753_v39 = vpop.f32.mrf.mxu0 }
 0x90d   : > { %v2082_v48 = vadd.f32 %v2753_v39, %v3203_v7 }
 0x90e   : > { %v2072_v18 = vpop.f32.mrf.mxu0 }
 0x90f   : > { %v2081_v41 = vadd.f32 %v2072_v18, %v3199_v4  ;;  %v2088_v49 = vsel %vm563_vm1, %v2082_v48, 0.0 }
 0x910   : > { %2089 = vadd.xlane.f32.xlu0 %v2088_v49 }
 0x911   : > { %v2085_v50 = vsel %vm563_vm1, %v2081_v41, 0.0 }
 0x912   : > { %2086 = vadd.xlane.f32.xlu1 %v2085_v50 }
 0x999   : > { %v2090_v51 = vpop.xlane.xlu0 %2089 }
 0x99a   : > { %v2093_v9 = vmul.f32 0.03125, %v2090_v51 }
 0x99b   : > { %v2087_v52 = vpop.xlane.xlu1 %2086 }
 0x99c   : > { %v2095_v10 = vsub.f32 %v2082_v48, %v2093_v9  ;;  %v2092_v53 = vmul.f32 0.03125, %v2087_v52 }
 0x99e   : > { %v2094_v54 = vsub.f32 %v2081_v41, %v2092_v53  ;;  %v2097_v7 = vmul.f32 %v2095_v10, %v2095_v10 }
 0x9a0   : > { %v2101_v55 = vsel %vm563_vm1, %v2097_v7, 0.0  ;;  %v2096_v4 = vmul.f32 %v2094_v54, %v2094_v54 }
 0x9a1   : > { %2102 = vadd.xlane.f32.xlu1 %v2101_v55  ;;  %v2582_v55 = vld [vmem:[%s3196_s12] ss:$0 sm:$0xff] }
 0x9a2   : > { %v2098_v56 = vsel %vm563_vm1, %v2096_v4, 0.0 }
 0x9a3   : > { %2099 = vadd.xlane.f32.xlu0 %v2098_v56 }
 0xa2a   : > { %v2103_v2 = vpop.xlane.xlu1 %2102 }
 0xa2b   : > { %v2105_v35 = vmul.f32 0.03125, %v2103_v2 }
 0xa2c   : > { %v2100_v5 = vpop.xlane.xlu0 %2099 }
 0xa2d   : > { %v2107_v6 = vadd.f32 1e-06, %v2105_v35  ;;  %v2104_v36 = vmul.f32 0.03125, %v2100_v5 }
 0xa2f   : > { %2889 = vrsqrt.f32 %v2107_v6  ;;  %v2106_v11 = vadd.f32 1e-06, %v2104_v36 }
 0xa31   : > { %2891 = vrsqrt.f32 %v2106_v11 }
 0xa3c   : > { %v2890_v12 = vpop.eup %2889 }
 0xa3d   : > { %v2111_v15 = vmul.f32 %v2890_v12, %v2095_v10 }
 0xa3e   : > { %v2892_v1 = vpop.eup %2891 }
 0xa3f   : > { %v2110_v16 = vmul.f32 %v2892_v1, %v2094_v54  ;;  %v2117_v17 = vmul.f32 %v2574_v13, %v2111_v15 }
 0xa41   : > { %v2116_v19 = vmul.f32 %v2574_v13, %v2110_v16  ;;  %v2123_v21 = vadd.f32 %v2575_v3, %v2117_v17 }
 0xa43   : > { %v2122_v20 = vadd.f32 %v2575_v3, %v2116_v19 }
 0xa45   : > { %2762 = vmatprep.mubr.msk.f32.mxu1 %vm563_vm1, %v2122_v20 }
 0xa46   : > { %2763 = vmatmul.mubr.msk.f32.vlgmr.msra.gmra.mxu1 %vm563_vm1, %v2123_v21 }
 0xb06   : > { %v2764_v27 = vpop.f32.mrf.mxu1 }
 0xb07   : > { %v2213_v28 = vadd.f32 %v2764_v27, %v2576_v26 }
 0xb08   : > { %v2207_v29 = vpop.f32.mrf.mxu1 }
 0xb09   : > { %v2208_v30 = vadd.f32 %v2576_v26, %v2207_v29  ;;  %v2217_v32 = vmax.f32 %v2213_v28, 0.0 }
 0xb0b   : > { %v2216_v31 = vmax.f32 %v2208_v30, 0.0 }
 0xb0d   : > { %2781 = vmatprep.mubr.msk.f32.mxu0 %vm2233_vm6, %v2216_v31 }
 0xb0e   : > { %2782 = vmatmul.mubr.msk.f32.vlgmr.msra.gmra.mxu0 %vm2233_vm6, %v2217_v32 }
 0xbce   : > { %v2783_v34 = vpop.f32.mrf.mxu0 }
 0xbcf   : > { %v2312_v37 = vadd.f32 %v2783_v34, %v2579_v33 }
 0xbd0   : > { %v2306_v38 = vpop.f32.mrf.mxu0 }
 0xbd1   : > { %v2307_v40 = vadd.f32 %v2579_v33, %v2306_v38  ;;  %v2316_v42 = vadd.f32 %v2312_v37, %v2123_v21 }
 0xbd3   : > { %v2322_v43 = vsel %vm563_vm1, %v2316_v42, 0.0  ;;  %v2315_v44 = vadd.f32 %v2307_v40, %v2122_v20 }
 0xbd4   : > { %2323 = vadd.xlane.f32.xlu1 %v2322_v43 }
 0xbd5   : > { %v2319_v45 = vsel %vm563_vm1, %v2315_v44, 0.0 }
 0xbd6   : > { %2320 = vadd.xlane.f32.xlu0 %v2319_v45 }
 0xc5d   : > { %v2324_v46 = vpop.xlane.xlu1 %2323 }
 0xc5e   : > { %v2326_v47 = vmul.f32 0.03125, %v2324_v46 }
 0xc5f   : > { %v2321_v8 = vpop.xlane.xlu0 %2320 }
 0xc60   : > { %v2328_v14 = vsub.f32 %v2316_v42, %v2326_v47  ;;  %v2325_v39 = vmul.f32 0.03125, %v2321_v8 }
 0xc62   : > { %v2327_v48 = vsub.f32 %v2315_v44, %v2325_v39  ;;  %v2330_v18 = vmul.f32 %v2328_v14, %v2328_v14 }
 0xc64   : > { %v2334_v41 = vsel %vm563_vm1, %v2330_v18, 0.0  ;;  %v2329_v49 = vmul.f32 %v2327_v48, %v2327_v48 }
 0xc65   : > { %2335 = vadd.xlane.f32.xlu1 %v2334_v41 }
 0xc66   : > { %v2331_v50 = vsel %vm563_vm1, %v2329_v49, 0.0 }
 0xc67   : > { %2332 = vadd.xlane.f32.xlu0 %v2331_v50 }
 0xcee   : > { %v2336_v51 = vpop.xlane.xlu1 %2335 }
 0xcef   : > { %v2338_v9 = vmul.f32 0.03125, %v2336_v51 }
 0xcf0   : > { %v2333_v52 = vpop.xlane.xlu0 %2332 }
 0xcf1   : > { %v2340_v10 = vadd.f32 1e-06, %v2338_v9  ;;  %v2337_v53 = vmul.f32 0.03125, %v2333_v52 }
 0xcf3   : > { %2893 = vrsqrt.f32 %v2340_v10  ;;  %v2339_v54 = vadd.f32 1e-06, %v2337_v53 }
 0xcf5   : > { %2895 = vrsqrt.f32 %v2339_v54 }
 0xd00   : > { %v2894_v7 = vpop.eup %2893 }
 0xd01   : > { %v2344_v4 = vmul.f32 %v2894_v7, %v2328_v14 }
 0xd02   : > { %v2896_v56 = vpop.eup %2895 }
 0xd03   : > { %v2343_v58 = vmul.f32 %v2896_v56, %v2327_v48  ;;  %v2350_v59 = vmul.f32 %v2582_v55, %v2344_v4 }
 0xd05   : > { %v2349_v60 = vmul.f32 %v2582_v55, %v2343_v58  ;;  %v2356_v61 = vadd.f32 %v2583_v57, %v2350_v59 }
 0xd07   : > { %v2355_v62 = vadd.f32 %v2583_v57, %v2349_v60  ;;  %2358 = vst.msk [vmem:[#allocation7 + $0x8] sm:$0xff] %vm563_vm1, %v2356_v61 }
 0xd09   : > { %2357 = vst.msk [vmem:[#allocation7] sm:$0xff] %vm563_vm1, %v2355_v62 }
 0xd0a   : > { %2962 = shalt.err (!%p2959_p5)
}
 0xd0b   : > { %s3032_s12 = smov 128  }
 0xd0c   : > { %2793 = dma.vmem_to_hbm [thread:$0]  (%p3422_p4), %s2369_s24, 256, %s3459_s10, [#allocation4], %s3032_s12, %s3032_s12, %s3028_s25  }
 0xd0d   : > { %2994 = dma.done.wait (%p3422_p4), [#allocation4], 256  }
 0xd0e   : > { %2996 = vsyncadd (%p3422_p4), [#allocation4], 4294967040 }
 0xd0f PF: > { %s23_s15 = sadd.s32 1, %s3007_s15   ;;  %s3476_s13 = smov %s3003_s14 }
 0xd10   : > { %p20_p8 = scmp.ge.s32.totalorder %s23_s15, 4   ;;  %s3477_s14 = smov %s3479_s17 }
 0xd12   :  { %22 = sbr.rel (!%p20_p8) target bundleno = 10 (0xa), region = 124 }
 0xd17   :  { %2384 = vsyncpa [#allocation3], 1 }
 0xd18   :  { %2386 = vsyncpa [#allocation3 + $0x1], 1 }
 0xd19   :  { %2387 = vsyncpa [#allocation6], 1 }
 0xd1a   :  { %2388 = vsyncpa [#allocation4], 1 }
 0xd1b   :  { %2390 = vsyncpa [#allocation4 + $0x1], 1 }

</bundles_post_ra>
